<compile_context>
chip_gen: v5e
topology: v5e:2x2
jax: 0.10.0
libtpu: 0.0.40
codegen_flags: <defaults>
</compile_context>

<pallas_src>
import functools

import jax
import jax.numpy as jnp
from jax import lax
from jax.experimental import pallas as pl
from jax.experimental.pallas import tpu as pltpu


# ------------------------------ fused kernel --------------------------------


def _irb_kernel(x_ref, m_ref, w1_ref, b1_ref, w2_ref, b2_ref,
                wz_ref, bz_ref, wdu1_ref, bdu1_ref, wdu2_ref, bdu2_ref,
                out_ref, xs1_ref, xs2_ref, *, H, W):
    """One batch element.  Layout: channels on sublanes, flattened HW on lanes.

    x_ref  : (C, HW)   f32   activations (identity path stays f32)
    m_ref  : (8, HW)   f32   precomputed border masks for the 8 off-centre taps
    w1_ref : (dc, 9*C) bf16  folded 3x3 weights (tap-major, Cin-minor)
    w2_ref : (C, 9*dc) bf16
    wz_ref : (C, C)    bf16  host-folded 1x1 (conv o distill_2)
    xs*_ref: VMEM scratch holding the folded-K operand of each 3x3 conv.
    """
    HW = H * W
    x_f32 = x_ref[...]                                   # (C, HW) f32

    def conv3x3(v_f32, xs_ref, w_ref, b_ref):
        # Build the 9 spatially shifted taps with XLU lane rotations
        # (pltpu.roll) + precomputed f32 border masks, storing each tap
        # straight into the folded-K scratch so the whole conv is ONE MXU
        # matmul  W(Cout, 9*Cin) @ xs(9*Cin, HW).
        cin = v_f32.shape[0]
        mi = 0
        for dh in range(3):
            for dw in range(3):
                sk = (dh - 1) * W + (dw - 1)             # flat spatial offset
                if dh == 1 and dw == 1:
                    t = v_f32                            # centre tap, no mask
                else:
                    t = pltpu.roll(v_f32, (-sk) % HW, axis=1)
                    t = t * m_ref[mi:mi + 1, :]          # mask in f32 (v5e-safe)
                    mi += 1
                ti = dh * 3 + dw
                xs_ref[ti * cin:(ti + 1) * cin, :] = t.astype(xs_ref.dtype)
        acc = jnp.dot(w_ref[...], xs_ref[...],
                      preferred_element_type=jnp.float32)
        return acc + b_ref[...]                          # (Cout, HW) f32

    # distill_1: 3x3 conv (C -> dc) + LeakyReLU(0.05)
    d1 = conv3x3(x_f32, xs1_ref, w1_ref, b1_ref)
    d1 = jnp.where(d1 >= 0.0, d1, 0.05 * d1)
    # mid_1: 3x3 conv (dc -> C); rem1 = input + mid1 (never leaves VMEM/vregs)
    rem1 = x_f32 + conv3x3(d1, xs2_ref, w2_ref, b2_ref)
    # conv(distill_2(rem1)): the two 1x1 convs were folded host-side in f32.
    z = jnp.dot(wz_ref[...], rem1.astype(wz_ref.dtype),
                preferred_element_type=jnp.float32) + bz_ref[...]
    # CCALayer1: per-channel spatial (population) std + mean, then
    # 1x1 -> ReLU -> 1x1 -> sigmoid channel gate.
    inv_hw = 1.0 / HW
    mean = jnp.sum(z, axis=1, keepdims=True) * inv_hw               # (C, 1)
    var = jnp.sum((z - mean) ** 2, axis=1, keepdims=True) * inv_hw
    y = jnp.sqrt(var) + mean                                        # (C, 1)
    h1 = jnp.maximum(
        jnp.sum(wdu1_ref[...] * y, axis=0, keepdims=True) + bdu1_ref[...],
        0.0)                                                         # (1, red)
    s = jax.nn.sigmoid(
        jnp.sum(wdu2_ref[...] * h1, axis=1, keepdims=True) + bdu2_ref[...])
    # output = F_in + z * s   -- single lane-dense f32 store
    out_ref[...] = (x_f32 + z * s).astype(out_ref.dtype)


# --------------------------------- wrapper -----------------------------------


def irb_nof1_forward(x_nchw, p):
    """IRB_noF1 forward.  Input / output are NCHW float32."""
    n, c, h, w = x_nchw.shape
    hw = h * w
    dc = c // 2
    lastc = c - dc
    bf = jnp.bfloat16
    assert hw % 128 == 0, "flattened H*W must be a multiple of 128 (lane axis)"

    hp = lax.Precision.HIGHEST

    # NCHW -> (N, C, HW): a pure reshape, no transpose, stays f32.
    x_flat = x_nchw.astype(jnp.float32).reshape(n, c, hw)

    # Precompute the 8 border-validity masks once (shared by both 3x3 convs).
    pidx = jnp.arange(hw, dtype=jnp.int32)
    hh, ww = pidx // w, pidx % w
    rows = []
    for dh in range(3):
        for dw in range(3):
            if dh == 1 and dw == 1:
                continue
            m = jnp.ones((hw,), jnp.float32)
            if dh == 0:
                m = m * (hh >= 1)
            elif dh == 2:
                m = m * (hh <= h - 2)
            if dw == 0:
                m = m * (ww >= 1)
            elif dw == 2:
                m = m * (ww <= w - 2)
            rows.append(m)
    masks = jnp.stack(rows, axis=0)                                  # (8, HW)

    # Fold 3x3 HWIO weights -> (Cout, 9*Cin), tap-major / Cin-minor,
    # matching the in-kernel (dh, dw) tap order.
    w1f = jnp.transpose(p["w1"].reshape(9, c, dc), (2, 0, 1)).reshape(dc, 9 * c)
    w2f = jnp.transpose(p["w2"].reshape(9, dc, c), (2, 0, 1)).reshape(c, 9 * dc)
    # Fold the two 1x1 convs (distill_2 then conv) in f32, single bf16 cast.
    wz = jnp.dot(p["wc"].T, p["wd2"].T, precision=hp)                # (C, C)
    bz = (jnp.dot(p["wc"].T, p["bd2"].reshape(lastc, 1), precision=hp)
          + p["bc"].reshape(c, 1))

    args = (
        x_flat, masks,
        w1f.astype(bf), p["b1"].reshape(dc, 1),
        w2f.astype(bf), p["b2"].reshape(c, 1),
        wz.astype(bf), bz,
        p["wdu1"], p["bdu1"],
        p["wdu2"].T, p["bdu2"].reshape(c, 1),
    )

    def full(a):
        nd = a.ndim
        return pl.BlockSpec(a.shape, lambda i: (0,) * nd)

    io_spec = pl.BlockSpec((None, c, hw), lambda i: (i, 0, 0))

    # Per-step VMEM estimate (double-buffered f32 I/O, folded-K bf16 scratch,
    # masks, f32 intermediates) with 2x headroom; keep below every chip's
    # physical VMEM (v7x: 64 MiB).
    est = (4 * c * hw * 4 + 9 * (c + dc) * hw * 2
           + 8 * hw * 4 + 8 * c * hw * 4)
    vmem_limit = int(min(max(2 * est, 32 * 1024 * 1024), 56 * 1024 * 1024))

    # TODO(synk): for large images (>~160px on v7x's 64 MiB VMEM) add an HW-tile
    # grid axis; that needs a +/-(W+1)-lane halo fetch or per-tile edge masks,
    # because the in-kernel rolls are only border-safe for whole-image blocks.
    out_flat = pl.pallas_call(
        functools.partial(_irb_kernel, H=h, W=w),
        out_shape=jax.ShapeDtypeStruct((n, c, hw), jnp.float32),
        grid=(n,),
        in_specs=[io_spec] + [full(a) for a in args[1:]],
        out_specs=io_spec,
        scratch_shapes=[pltpu.VMEM((9 * c, hw), bf),
                        pltpu.VMEM((9 * dc, hw), bf)],
        compiler_params=pltpu.CompilerParams(
            dimension_semantics=("parallel",),     # batch across TCs on v7x
            vmem_limit_bytes=vmem_limit),
    )(*args)
    return out_flat.reshape(n, c, h, w)


# --------------------------- params & reference ------------------------------


def init_params(key, c):
    dc = c // 2
    lastc = c - dc
    red = max(c // 16, 1)
    ks = jax.random.split(key, 12)
    w = lambda k, s: jax.random.normal(k, s, jnp.float32) * 0.1
    b = lambda k, s: jax.random.normal(k, s, jnp.float32) * 0.05
    return {
        "w1": w(ks[0], (3, 3, c, dc)),   "b1": b(ks[1], (1, dc)),
        "w2": w(ks[2], (3, 3, dc, c)),   "b2": b(ks[3], (1, c)),
        "wd2": w(ks[4], (c, lastc)),     "bd2": b(ks[5], (1, lastc)),
        "wc": w(ks[6], (lastc, c)),      "bc": b(ks[7], (1, c)),
        "wdu1": w(ks[8], (c, red)),      "bdu1": b(ks[9], (1, red)),
        "wdu2": w(ks[10], (red, c)),     "bdu2": b(ks[11], (1, c)),
    }


def ref_forward(x_nchw, p):
    x = jnp.transpose(x_nchw, (0, 2, 3, 1)).astype(jnp.float32)
    hp = lax.Precision.HIGHEST
    conv3 = lambda v, w, b: lax.conv_general_dilated(
        v, w, (1, 1), ((1, 1), (1, 1)),
        dimension_numbers=("NHWC", "HWIO", "NHWC"), precision=hp) + b[0]
    conv1 = lambda v, w, b: jnp.einsum("nhwc,co->nhwo", v, w, precision=hp) + b[0]
    lrelu = lambda v: jnp.where(v >= 0, v, 0.05 * v)
    dist1 = lrelu(conv3(x, p["w1"], p["b1"]))
    rem1 = x + conv3(dist1, p["w2"], p["b2"])
    dist2 = conv1(rem1, p["wd2"], p["bd2"])
    z = conv1(dist2, p["wc"], p["bc"])
    mean = jnp.mean(z, axis=(1, 2), keepdims=True)
    std = jnp.sqrt(jnp.mean((z - mean) ** 2, axis=(1, 2), keepdims=True))
    y = std + mean
    h = jnp.maximum(jnp.einsum("nhwc,co->nhwo", y, p["wdu1"], precision=hp)
                    + p["bdu1"][0], 0.0)
    s = jax.nn.sigmoid(jnp.einsum("nhwc,co->nhwo", h, p["wdu2"], precision=hp)
                       + p["bdu2"][0])
    out = x + z * s
    return jnp.transpose(out, (0, 3, 1, 2))


# ----------------------------------- main ------------------------------------

if __name__ == "__main__":
    key = jax.random.PRNGKey(0)
    kx, kp = jax.random.split(key)
    N, C, H, W = 2, 32, 16, 16       # in_channels=32 so channel // 16 >= 1
    x = jax.random.normal(kx, (N, C, H, W), jnp.float32)
    params = init_params(kp, C)

    out = jax.block_until_ready(jax.jit(irb_nof1_forward)(x, params))
    assert out.shape == (N, C, H, W)

    ref = ref_forward(x, params)
    # bf16 MXU operands with f32 accumulation -> mixed abs/rel tolerance.
    err = float(jnp.max(jnp.abs(out - ref) / (5e-2 + 2e-2 * jnp.abs(ref))))
    if not err < 1.0:
        raise AssertionError(f"mismatch vs reference: normalized err {err:.3f}")
    print("KERNEL_OK")
</pallas_src>

<mosaic_0001>
module attributes {stable_mosaic.version = 11 : i64} {
  func.func @_irb_kernel(%arg0: i32, %arg1: memref<1x32x256xf32, #tpu.memory_space<vmem>>, %arg2: memref<8x256xf32, #tpu.memory_space<vmem>>, %arg3: memref<16x288xbf16, #tpu.memory_space<vmem>>, %arg4: memref<16x1xf32, #tpu.memory_space<vmem>>, %arg5: memref<32x144xbf16, #tpu.memory_space<vmem>>, %arg6: memref<32x1xf32, #tpu.memory_space<vmem>>, %arg7: memref<32x32xbf16, #tpu.memory_space<vmem>>, %arg8: memref<32x1xf32, #tpu.memory_space<vmem>>, %arg9: memref<32x2xf32, #tpu.memory_space<vmem>>, %arg10: memref<1x2xf32, #tpu.memory_space<vmem>>, %arg11: memref<32x2xf32, #tpu.memory_space<vmem>>, %arg12: memref<32x1xf32, #tpu.memory_space<vmem>>, %arg13: memref<1x32x256xf32, #tpu.memory_space<vmem>>, %arg14: memref<288x256xbf16, #tpu.memory_space<vmem>>, %arg15: memref<144x256xbf16, #tpu.memory_space<vmem>>) attributes {dimension_semantics = [#tpu.dimension_semantics<parallel>], iteration_bounds = array<i64: 2>, scalar_prefetch = 0 : i64, scratch_operands = 2 : i64, tpu.core_type = #tpu.core_type<tc>, window_params = [{transform_indices = @transform_0, window_bounds = array<i64: 1, 32, 256>}, {pipeline_mode = #tpu.pipeline_mode<synchronous>, transform_indices = @transform_1, window_bounds = array<i64: 8, 256>}, {pipeline_mode = #tpu.pipeline_mode<synchronous>, transform_indices = @transform_2, window_bounds = array<i64: 16, 288>}, {pipeline_mode = #tpu.pipeline_mode<synchronous>, transform_indices = @transform_3, window_bounds = array<i64: 16, 1>}, {pipeline_mode = #tpu.pipeline_mode<synchronous>, transform_indices = @transform_4, window_bounds = array<i64: 32, 144>}, {pipeline_mode = #tpu.pipeline_mode<synchronous>, transform_indices = @transform_5, window_bounds = array<i64: 32, 1>}, {pipeline_mode = #tpu.pipeline_mode<synchronous>, transform_indices = @transform_6, window_bounds = array<i64: 32, 32>}, {pipeline_mode = #tpu.pipeline_mode<synchronous>, transform_indices = @transform_7, window_bounds = array<i64: 32, 1>}, {pipeline_mode = #tpu.pipeline_mode<synchronous>, transform_indices = @transform_8, window_bounds = array<i64: 32, 2>}, {pipeline_mode = #tpu.pipeline_mode<synchronous>, transform_indices = @transform_9, window_bounds = array<i64: 1, 2>}, {pipeline_mode = #tpu.pipeline_mode<synchronous>, transform_indices = @transform_10, window_bounds = array<i64: 32, 2>}, {pipeline_mode = #tpu.pipeline_mode<synchronous>, transform_indices = @transform_11, window_bounds = array<i64: 32, 1>}, {transform_indices = @transform_12, window_bounds = array<i64: 1, 32, 256>}]} {
    %c0 = arith.constant 0 : index
    %c0_0 = arith.constant 0 : index
    %c0_1 = arith.constant 0 : index
    %0 = vector.load %arg1[%c0, %c0_0, %c0_1] : memref<1x32x256xf32, #tpu.memory_space<vmem>>, vector<1x32x256xf32>
    %1 = vector.shape_cast %0 : vector<1x32x256xf32> to vector<32x256xf32>
    %c17_i32 = arith.constant 17 : i32
    %2 = tpu.dynamic_rotate %1 by %c17_i32 dim 1 : vector<32x256xf32>, i32 -> vector<32x256xf32>
    %c0_2 = arith.constant 0 : index
    %c0_3 = arith.constant 0 : index
    %3 = vector.load %arg2[%c0_2, %c0_3] : memref<8x256xf32, #tpu.memory_space<vmem>>, vector<1x256xf32>
    %4 = vector.broadcast %3 : vector<1x256xf32> to vector<32x256xf32>
    %5 = arith.mulf %2, %4 : vector<32x256xf32>
    %6 = arith.truncf %5 : vector<32x256xf32> to vector<32x256xbf16>
    %c0_4 = arith.constant 0 : index
    %c0_5 = arith.constant 0 : index
    %7 = vector.load %arg14[%c0_4, %c0_5] : memref<288x256xbf16, #tpu.memory_space<vmem>>, vector<32x256xbf16>
    tpu.vector_store %arg14[%c0_4, %c0_5], %6 {strides = array<i32>} : memref<288x256xbf16, #tpu.memory_space<vmem>>, vector<32x256xbf16>,
    %c16_i32 = arith.constant 16 : i32
    %8 = tpu.dynamic_rotate %1 by %c16_i32 dim 1 : vector<32x256xf32>, i32 -> vector<32x256xf32>
    %c1 = arith.constant 1 : index
    %c0_6 = arith.constant 0 : index
    %9 = vector.load %arg2[%c1, %c0_6] : memref<8x256xf32, #tpu.memory_space<vmem>>, vector<1x256xf32>
    %10 = vector.broadcast %9 : vector<1x256xf32> to vector<32x256xf32>
    %11 = arith.mulf %8, %10 : vector<32x256xf32>
    %12 = arith.truncf %11 : vector<32x256xf32> to vector<32x256xbf16>
    %c32 = arith.constant 32 : index
    %c0_7 = arith.constant 0 : index
    %13 = vector.load %arg14[%c32, %c0_7] : memref<288x256xbf16, #tpu.memory_space<vmem>>, vector<32x256xbf16>
    tpu.vector_store %arg14[%c32, %c0_7], %12 {strides = array<i32>} : memref<288x256xbf16, #tpu.memory_space<vmem>>, vector<32x256xbf16>,
    %c15_i32 = arith.constant 15 : i32
    %14 = tpu.dynamic_rotate %1 by %c15_i32 dim 1 : vector<32x256xf32>, i32 -> vector<32x256xf32>
    %c2 = arith.constant 2 : index
    %c0_8 = arith.constant 0 : index
    %15 = vector.load %arg2[%c2, %c0_8] : memref<8x256xf32, #tpu.memory_space<vmem>>, vector<1x256xf32>
    %16 = vector.broadcast %15 : vector<1x256xf32> to vector<32x256xf32>
    %17 = arith.mulf %14, %16 : vector<32x256xf32>
    %18 = arith.truncf %17 : vector<32x256xf32> to vector<32x256xbf16>
    %c64 = arith.constant 64 : index
    %c0_9 = arith.constant 0 : index
    %19 = vector.load %arg14[%c64, %c0_9] : memref<288x256xbf16, #tpu.memory_space<vmem>>, vector<32x256xbf16>
    tpu.vector_store %arg14[%c64, %c0_9], %18 {strides = array<i32>} : memref<288x256xbf16, #tpu.memory_space<vmem>>, vector<32x256xbf16>,
    %c1_i32 = arith.constant 1 : i32
    %20 = tpu.dynamic_rotate %1 by %c1_i32 dim 1 : vector<32x256xf32>, i32 -> vector<32x256xf32>
    %c3 = arith.constant 3 : index
    %c0_10 = arith.constant 0 : index
    %21 = vector.load %arg2[%c3, %c0_10] : memref<8x256xf32, #tpu.memory_space<vmem>>, vector<1x256xf32>
    %22 = vector.broadcast %21 : vector<1x256xf32> to vector<32x256xf32>
    %23 = arith.mulf %20, %22 : vector<32x256xf32>
    %24 = arith.truncf %23 : vector<32x256xf32> to vector<32x256xbf16>
    %c96 = arith.constant 96 : index
    %c0_11 = arith.constant 0 : index
    %25 = vector.load %arg14[%c96, %c0_11] : memref<288x256xbf16, #tpu.memory_space<vmem>>, vector<32x256xbf16>
    tpu.vector_store %arg14[%c96, %c0_11], %24 {strides = array<i32>} : memref<288x256xbf16, #tpu.memory_space<vmem>>, vector<32x256xbf16>,
    %26 = arith.truncf %1 : vector<32x256xf32> to vector<32x256xbf16>
    %c128 = arith.constant 128 : index
    %c0_12 = arith.constant 0 : index
    %27 = vector.load %arg14[%c128, %c0_12] : memref<288x256xbf16, #tpu.memory_space<vmem>>, vector<32x256xbf16>
    tpu.vector_store %arg14[%c128, %c0_12], %26 {strides = array<i32>} : memref<288x256xbf16, #tpu.memory_space<vmem>>, vector<32x256xbf16>,
    %c255_i32 = arith.constant 255 : i32
    %28 = tpu.dynamic_rotate %1 by %c255_i32 dim 1 : vector<32x256xf32>, i32 -> vector<32x256xf32>
    %c4 = arith.constant 4 : index
    %c0_13 = arith.constant 0 : index
    %29 = vector.load %arg2[%c4, %c0_13] : memref<8x256xf32, #tpu.memory_space<vmem>>, vector<1x256xf32>
    %30 = vector.broadcast %29 : vector<1x256xf32> to vector<32x256xf32>
    %31 = arith.mulf %28, %30 : vector<32x256xf32>
    %32 = arith.truncf %31 : vector<32x256xf32> to vector<32x256xbf16>
    %c160 = arith.constant 160 : index
    %c0_14 = arith.constant 0 : index
    %33 = vector.load %arg14[%c160, %c0_14] : memref<288x256xbf16, #tpu.memory_space<vmem>>, vector<32x256xbf16>
    tpu.vector_store %arg14[%c160, %c0_14], %32 {strides = array<i32>} : memref<288x256xbf16, #tpu.memory_space<vmem>>, vector<32x256xbf16>,
    %c241_i32 = arith.constant 241 : i32
    %34 = tpu.dynamic_rotate %1 by %c241_i32 dim 1 : vector<32x256xf32>, i32 -> vector<32x256xf32>
    %c5 = arith.constant 5 : index
    %c0_15 = arith.constant 0 : index
    %35 = vector.load %arg2[%c5, %c0_15] : memref<8x256xf32, #tpu.memory_space<vmem>>, vector<1x256xf32>
    %36 = vector.broadcast %35 : vector<1x256xf32> to vector<32x256xf32>
    %37 = arith.mulf %34, %36 : vector<32x256xf32>
    %38 = arith.truncf %37 : vector<32x256xf32> to vector<32x256xbf16>
    %c192 = arith.constant 192 : index
    %c0_16 = arith.constant 0 : index
    %39 = vector.load %arg14[%c192, %c0_16] : memref<288x256xbf16, #tpu.memory_space<vmem>>, vector<32x256xbf16>
    tpu.vector_store %arg14[%c192, %c0_16], %38 {strides = array<i32>} : memref<288x256xbf16, #tpu.memory_space<vmem>>, vector<32x256xbf16>,
    %c240_i32 = arith.constant 240 : i32
    %40 = tpu.dynamic_rotate %1 by %c240_i32 dim 1 : vector<32x256xf32>, i32 -> vector<32x256xf32>
    %c6 = arith.constant 6 : index
    %c0_17 = arith.constant 0 : index
    %41 = vector.load %arg2[%c6, %c0_17] : memref<8x256xf32, #tpu.memory_space<vmem>>, vector<1x256xf32>
    %42 = vector.broadcast %41 : vector<1x256xf32> to vector<32x256xf32>
    %43 = arith.mulf %40, %42 : vector<32x256xf32>
    %44 = arith.truncf %43 : vector<32x256xf32> to vector<32x256xbf16>
    %c224 = arith.constant 224 : index
    %c0_18 = arith.constant 0 : index
    %45 = vector.load %arg14[%c224, %c0_18] : memref<288x256xbf16, #tpu.memory_space<vmem>>, vector<32x256xbf16>
    tpu.vector_store %arg14[%c224, %c0_18], %44 {strides = array<i32>} : memref<288x256xbf16, #tpu.memory_space<vmem>>, vector<32x256xbf16>,
    %c239_i32 = arith.constant 239 : i32
    %46 = tpu.dynamic_rotate %1 by %c239_i32 dim 1 : vector<32x256xf32>, i32 -> vector<32x256xf32>
    %c7 = arith.constant 7 : index
    %c0_19 = arith.constant 0 : index
    %47 = vector.load %arg2[%c7, %c0_19] : memref<8x256xf32, #tpu.memory_space<vmem>>, vector<1x256xf32>
    %48 = vector.broadcast %47 : vector<1x256xf32> to vector<32x256xf32>
    %49 = arith.mulf %46, %48 : vector<32x256xf32>
    %50 = arith.truncf %49 : vector<32x256xf32> to vector<32x256xbf16>
    %c256 = arith.constant 256 : index
    %c0_20 = arith.constant 0 : index
    %51 = vector.load %arg14[%c256, %c0_20] : memref<288x256xbf16, #tpu.memory_space<vmem>>, vector<32x256xbf16>
    tpu.vector_store %arg14[%c256, %c0_20], %50 {strides = array<i32>} : memref<288x256xbf16, #tpu.memory_space<vmem>>, vector<32x256xbf16>,
    %c0_21 = arith.constant 0 : index
    %c0_22 = arith.constant 0 : index
    %52 = vector.load %arg3[%c0_21, %c0_22] : memref<16x288xbf16, #tpu.memory_space<vmem>>, vector<16x288xbf16>
    %c0_23 = arith.constant 0 : index
    %c0_24 = arith.constant 0 : index
    %53 = vector.load %arg14[%c0_23, %c0_24] : memref<288x256xbf16, #tpu.memory_space<vmem>>, vector<288x256xbf16>
    %cst = arith.constant dense<0.000000e+00> : vector<16x256xf32>
    %54 = tpu.matmul %52, %53, %cst {dimension_numbers = #tpu.dot_dimension_numbers<[1], [0], [0], [1], [0, 0, 1, 1], [], []>} : vector<16x288xbf16>, vector<288x256xbf16>, vector<16x256xf32> -> vector<16x256xf32>
    %c0_25 = arith.constant 0 : index
    %c0_26 = arith.constant 0 : index
    %55 = vector.load %arg4[%c0_25, %c0_26] : memref<16x1xf32, #tpu.memory_space<vmem>>, vector<16x1xf32>
    %56 = vector.broadcast %55 : vector<16x1xf32> to vector<16x256xf32>
    %57 = arith.addf %54, %56 : vector<16x256xf32>
    %cst_27 = arith.constant 0.000000e+00 : f32
    %58 = vector.broadcast %cst_27 : f32 to vector<16x256xf32>
    %59 = arith.cmpf oge, %57, %58 : vector<16x256xf32>
    %cst_28 = arith.constant 5.000000e-02 : f32
    %60 = vector.broadcast %cst_28 : f32 to vector<16x256xf32>
    %61 = arith.mulf %60, %57 : vector<16x256xf32>
    %62 = arith.select %59, %57, %61 : vector<16x256xi1>, vector<16x256xf32>
    %c17_i32_29 = arith.constant 17 : i32
    %63 = tpu.dynamic_rotate %62 by %c17_i32_29 dim 1 : vector<16x256xf32>, i32 -> vector<16x256xf32>
    %c0_30 = arith.constant 0 : index
    %c0_31 = arith.constant 0 : index
    %64 = vector.load %arg2[%c0_30, %c0_31] : memref<8x256xf32, #tpu.memory_space<vmem>>, vector<1x256xf32>
    %65 = vector.broadcast %64 : vector<1x256xf32> to vector<16x256xf32>
    %66 = arith.mulf %63, %65 : vector<16x256xf32>
    %67 = arith.truncf %66 : vector<16x256xf32> to vector<16x256xbf16>
    %c0_32 = arith.constant 0 : index
    %c0_33 = arith.constant 0 : index
    %68 = vector.load %arg15[%c0_32, %c0_33] : memref<144x256xbf16, #tpu.memory_space<vmem>>, vector<16x256xbf16>
    tpu.vector_store %arg15[%c0_32, %c0_33], %67 {strides = array<i32>} : memref<144x256xbf16, #tpu.memory_space<vmem>>, vector<16x256xbf16>,
    %c16_i32_34 = arith.constant 16 : i32
    %69 = tpu.dynamic_rotate %62 by %c16_i32_34 dim 1 : vector<16x256xf32>, i32 -> vector<16x256xf32>
    %c1_35 = arith.constant 1 : index
    %c0_36 = arith.constant 0 : index
    %70 = vector.load %arg2[%c1_35, %c0_36] : memref<8x256xf32, #tpu.memory_space<vmem>>, vector<1x256xf32>
    %71 = vector.broadcast %70 : vector<1x256xf32> to vector<16x256xf32>
    %72 = arith.mulf %69, %71 : vector<16x256xf32>
    %73 = arith.truncf %72 : vector<16x256xf32> to vector<16x256xbf16>
    %c16 = arith.constant 16 : index
    %c0_37 = arith.constant 0 : index
    %74 = vector.load %arg15[%c16, %c0_37] : memref<144x256xbf16, #tpu.memory_space<vmem>>, vector<16x256xbf16>
    tpu.vector_store %arg15[%c16, %c0_37], %73 {strides = array<i32>} : memref<144x256xbf16, #tpu.memory_space<vmem>>, vector<16x256xbf16>,
    %c15_i32_38 = arith.constant 15 : i32
    %75 = tpu.dynamic_rotate %62 by %c15_i32_38 dim 1 : vector<16x256xf32>, i32 -> vector<16x256xf32>
    %c2_39 = arith.constant 2 : index
    %c0_40 = arith.constant 0 : index
    %76 = vector.load %arg2[%c2_39, %c0_40] : memref<8x256xf32, #tpu.memory_space<vmem>>, vector<1x256xf32>
    %77 = vector.broadcast %76 : vector<1x256xf32> to vector<16x256xf32>
    %78 = arith.mulf %75, %77 : vector<16x256xf32>
    %79 = arith.truncf %78 : vector<16x256xf32> to vector<16x256xbf16>
    %c32_41 = arith.constant 32 : index
    %c0_42 = arith.constant 0 : index
    %80 = vector.load %arg15[%c32_41, %c0_42] : memref<144x256xbf16, #tpu.memory_space<vmem>>, vector<16x256xbf16>
    tpu.vector_store %arg15[%c32_41, %c0_42], %79 {strides = array<i32>} : memref<144x256xbf16, #tpu.memory_space<vmem>>, vector<16x256xbf16>,
    %c1_i32_43 = arith.constant 1 : i32
    %81 = tpu.dynamic_rotate %62 by %c1_i32_43 dim 1 : vector<16x256xf32>, i32 -> vector<16x256xf32>
    %c3_44 = arith.constant 3 : index
    %c0_45 = arith.constant 0 : index
    %82 = vector.load %arg2[%c3_44, %c0_45] : memref<8x256xf32, #tpu.memory_space<vmem>>, vector<1x256xf32>
    %83 = vector.broadcast %82 : vector<1x256xf32> to vector<16x256xf32>
    %84 = arith.mulf %81, %83 : vector<16x256xf32>
    %85 = arith.truncf %84 : vector<16x256xf32> to vector<16x256xbf16>
    %c48 = arith.constant 48 : index
    %c0_46 = arith.constant 0 : index
    %86 = vector.load %arg15[%c48, %c0_46] : memref<144x256xbf16, #tpu.memory_space<vmem>>, vector<16x256xbf16>
    tpu.vector_store %arg15[%c48, %c0_46], %85 {strides = array<i32>} : memref<144x256xbf16, #tpu.memory_space<vmem>>, vector<16x256xbf16>,
    %87 = arith.truncf %62 : vector<16x256xf32> to vector<16x256xbf16>
    %c64_47 = arith.constant 64 : index
    %c0_48 = arith.constant 0 : index
    %88 = vector.load %arg15[%c64_47, %c0_48] : memref<144x256xbf16, #tpu.memory_space<vmem>>, vector<16x256xbf16>
    tpu.vector_store %arg15[%c64_47, %c0_48], %87 {strides = array<i32>} : memref<144x256xbf16, #tpu.memory_space<vmem>>, vector<16x256xbf16>,
    %c255_i32_49 = arith.constant 255 : i32
    %89 = tpu.dynamic_rotate %62 by %c255_i32_49 dim 1 : vector<16x256xf32>, i32 -> vector<16x256xf32>
    %c4_50 = arith.constant 4 : index
    %c0_51 = arith.constant 0 : index
    %90 = vector.load %arg2[%c4_50, %c0_51] : memref<8x256xf32, #tpu.memory_space<vmem>>, vector<1x256xf32>
    %91 = vector.broadcast %90 : vector<1x256xf32> to vector<16x256xf32>
    %92 = arith.mulf %89, %91 : vector<16x256xf32>
    %93 = arith.truncf %92 : vector<16x256xf32> to vector<16x256xbf16>
    %c80 = arith.constant 80 : index
    %c0_52 = arith.constant 0 : index
    %94 = vector.load %arg15[%c80, %c0_52] : memref<144x256xbf16, #tpu.memory_space<vmem>>, vector<16x256xbf16>
    tpu.vector_store %arg15[%c80, %c0_52], %93 {strides = array<i32>} : memref<144x256xbf16, #tpu.memory_space<vmem>>, vector<16x256xbf16>,
    %c241_i32_53 = arith.constant 241 : i32
    %95 = tpu.dynamic_rotate %62 by %c241_i32_53 dim 1 : vector<16x256xf32>, i32 -> vector<16x256xf32>
    %c5_54 = arith.constant 5 : index
    %c0_55 = arith.constant 0 : index
    %96 = vector.load %arg2[%c5_54, %c0_55] : memref<8x256xf32, #tpu.memory_space<vmem>>, vector<1x256xf32>
    %97 = vector.broadcast %96 : vector<1x256xf32> to vector<16x256xf32>
    %98 = arith.mulf %95, %97 : vector<16x256xf32>
    %99 = arith.truncf %98 : vector<16x256xf32> to vector<16x256xbf16>
    %c96_56 = arith.constant 96 : index
    %c0_57 = arith.constant 0 : index
    %100 = vector.load %arg15[%c96_56, %c0_57] : memref<144x256xbf16, #tpu.memory_space<vmem>>, vector<16x256xbf16>
    tpu.vector_store %arg15[%c96_56, %c0_57], %99 {strides = array<i32>} : memref<144x256xbf16, #tpu.memory_space<vmem>>, vector<16x256xbf16>,
    %c240_i32_58 = arith.constant 240 : i32
    %101 = tpu.dynamic_rotate %62 by %c240_i32_58 dim 1 : vector<16x256xf32>, i32 -> vector<16x256xf32>
    %c6_59 = arith.constant 6 : index
    %c0_60 = arith.constant 0 : index
    %102 = vector.load %arg2[%c6_59, %c0_60] : memref<8x256xf32, #tpu.memory_space<vmem>>, vector<1x256xf32>
    %103 = vector.broadcast %102 : vector<1x256xf32> to vector<16x256xf32>
    %104 = arith.mulf %101, %103 : vector<16x256xf32>
    %105 = arith.truncf %104 : vector<16x256xf32> to vector<16x256xbf16>
    %c112 = arith.constant 112 : index
    %c0_61 = arith.constant 0 : index
    %106 = vector.load %arg15[%c112, %c0_61] : memref<144x256xbf16, #tpu.memory_space<vmem>>, vector<16x256xbf16>
    tpu.vector_store %arg15[%c112, %c0_61], %105 {strides = array<i32>} : memref<144x256xbf16, #tpu.memory_space<vmem>>, vector<16x256xbf16>,
    %c239_i32_62 = arith.constant 239 : i32
    %107 = tpu.dynamic_rotate %62 by %c239_i32_62 dim 1 : vector<16x256xf32>, i32 -> vector<16x256xf32>
    %c7_63 = arith.constant 7 : index
    %c0_64 = arith.constant 0 : index
    %108 = vector.load %arg2[%c7_63, %c0_64] : memref<8x256xf32, #tpu.memory_space<vmem>>, vector<1x256xf32>
    %109 = vector.broadcast %108 : vector<1x256xf32> to vector<16x256xf32>
    %110 = arith.mulf %107, %109 : vector<16x256xf32>
    %111 = arith.truncf %110 : vector<16x256xf32> to vector<16x256xbf16>
    %c128_65 = arith.constant 128 : index
    %c0_66 = arith.constant 0 : index
    %112 = vector.load %arg15[%c128_65, %c0_66] : memref<144x256xbf16, #tpu.memory_space<vmem>>, vector<16x256xbf16>
    tpu.vector_store %arg15[%c128_65, %c0_66], %111 {strides = array<i32>} : memref<144x256xbf16, #tpu.memory_space<vmem>>, vector<16x256xbf16>,
    %c0_67 = arith.constant 0 : index
    %c0_68 = arith.constant 0 : index
    %113 = vector.load %arg5[%c0_67, %c0_68] : memref<32x144xbf16, #tpu.memory_space<vmem>>, vector<32x144xbf16>
    %c0_69 = arith.constant 0 : index
    %c0_70 = arith.constant 0 : index
    %114 = vector.load %arg15[%c0_69, %c0_70] : memref<144x256xbf16, #tpu.memory_space<vmem>>, vector<144x256xbf16>
    %cst_71 = arith.constant dense<0.000000e+00> : vector<32x256xf32>
    %115 = tpu.matmul %113, %114, %cst_71 {dimension_numbers = #tpu.dot_dimension_numbers<[1], [0], [0], [1], [0, 0, 1, 1], [], []>} : vector<32x144xbf16>, vector<144x256xbf16>, vector<32x256xf32> -> vector<32x256xf32>
    %c0_72 = arith.constant 0 : index
    %c0_73 = arith.constant 0 : index
    %116 = vector.load %arg6[%c0_72, %c0_73] : memref<32x1xf32, #tpu.memory_space<vmem>>, vector<32x1xf32>
    %117 = vector.broadcast %116 : vector<32x1xf32> to vector<32x256xf32>
    %118 = arith.addf %115, %117 : vector<32x256xf32>
    %119 = arith.addf %1, %118 : vector<32x256xf32>
    %c0_74 = arith.constant 0 : index
    %c0_75 = arith.constant 0 : index
    %120 = vector.load %arg7[%c0_74, %c0_75] : memref<32x32xbf16, #tpu.memory_space<vmem>>, vector<32x32xbf16>
    %121 = arith.truncf %119 : vector<32x256xf32> to vector<32x256xbf16>
    %cst_76 = arith.constant dense<0.000000e+00> : vector<32x256xf32>
    %122 = tpu.matmul %120, %121, %cst_76 {dimension_numbers = #tpu.dot_dimension_numbers<[1], [0], [0], [1], [0, 0, 1, 1], [], []>} : vector<32x32xbf16>, vector<32x256xbf16>, vector<32x256xf32> -> vector<32x256xf32>
    %c0_77 = arith.constant 0 : index
    %c0_78 = arith.constant 0 : index
    %123 = vector.load %arg8[%c0_77, %c0_78] : memref<32x1xf32, #tpu.memory_space<vmem>>, vector<32x1xf32>
    %124 = vector.broadcast %123 : vector<32x1xf32> to vector<32x256xf32>
    %125 = arith.addf %122, %124 : vector<32x256xf32>
    %cst_79 = arith.constant dense<0.000000e+00> : vector<32xf32>
    %126 = vector.multi_reduction <add>, %125, %cst_79 [1] : vector<32x256xf32> to vector<32xf32>
    %127 = vector.shape_cast %126 : vector<32xf32> to vector<32x1xf32>
    %cst_80 = arith.constant 3.906250e-03 : f32
    %128 = vector.broadcast %cst_80 : f32 to vector<32x1xf32>
    %129 = arith.mulf %127, %128 : vector<32x1xf32>
    %130 = vector.broadcast %129 : vector<32x1xf32> to vector<32x256xf32>
    %131 = arith.subf %125, %130 : vector<32x256xf32>
    %132 = arith.mulf %131, %131 : vector<32x256xf32>
    %cst_81 = arith.constant dense<0.000000e+00> : vector<32xf32>
    %133 = vector.multi_reduction <add>, %132, %cst_81 [1] : vector<32x256xf32> to vector<32xf32>
    %134 = vector.shape_cast %133 : vector<32xf32> to vector<32x1xf32>
    %cst_82 = arith.constant 3.906250e-03 : f32
    %135 = vector.broadcast %cst_82 : f32 to vector<32x1xf32>
    %136 = arith.mulf %134, %135 : vector<32x1xf32>
    %137 = math.sqrt %136 : vector<32x1xf32>
    %138 = arith.addf %137, %129 : vector<32x1xf32>
    %c0_83 = arith.constant 0 : index
    %c0_84 = arith.constant 0 : index
    %139 = vector.load %arg9[%c0_83, %c0_84] : memref<32x2xf32, #tpu.memory_space<vmem>>, vector<32x2xf32>
    %140 = vector.broadcast %138 : vector<32x1xf32> to vector<32x2xf32>
    %141 = arith.mulf %139, %140 : vector<32x2xf32>
    %cst_85 = arith.constant dense<0.000000e+00> : vector<2xf32>
    %142 = vector.multi_reduction <add>, %141, %cst_85 [0] : vector<32x2xf32> to vector<2xf32>
    %143 = vector.shape_cast %142 : vector<2xf32> to vector<1x2xf32>
    %c0_86 = arith.constant 0 : index
    %c0_87 = arith.constant 0 : index
    %144 = vector.load %arg10[%c0_86, %c0_87] : memref<1x2xf32, #tpu.memory_space<vmem>>, vector<1x2xf32>
    %145 = arith.addf %143, %144 : vector<1x2xf32>
    %cst_88 = arith.constant 0.000000e+00 : f32
    %146 = vector.broadcast %cst_88 : f32 to vector<1x2xf32>
    %147 = arith.maximumf %145, %146 : vector<1x2xf32>
    %c0_89 = arith.constant 0 : index
    %c0_90 = arith.constant 0 : index
    %148 = vector.load %arg11[%c0_89, %c0_90] : memref<32x2xf32, #tpu.memory_space<vmem>>, vector<32x2xf32>
    %149 = vector.broadcast %147 : vector<1x2xf32> to vector<32x2xf32>
    %150 = arith.mulf %148, %149 : vector<32x2xf32>
    %cst_91 = arith.constant dense<0.000000e+00> : vector<32xf32>
    %151 = vector.multi_reduction <add>, %150, %cst_91 [1] : vector<32x2xf32> to vector<32xf32>
    %152 = vector.shape_cast %151 : vector<32xf32> to vector<32x1xf32>
    %c0_92 = arith.constant 0 : index
    %c0_93 = arith.constant 0 : index
    %153 = vector.load %arg12[%c0_92, %c0_93] : memref<32x1xf32, #tpu.memory_space<vmem>>, vector<32x1xf32>
    %154 = arith.addf %152, %153 : vector<32x1xf32>
    %155 = arith.negf %154 : vector<32x1xf32>
    %156 = math.exp %155 : vector<32x1xf32>
    %cst_94 = arith.constant 1.000000e+00 : f32
    %157 = vector.broadcast %cst_94 : f32 to vector<32x1xf32>
    %158 = arith.addf %157, %156 : vector<32x1xf32>
    %159 = arith.divf %157, %158 : vector<32x1xf32>
    %160 = vector.broadcast %159 : vector<32x1xf32> to vector<32x256xf32>
    %161 = arith.mulf %125, %160 : vector<32x256xf32>
    %162 = arith.addf %1, %161 : vector<32x256xf32>
    %c0_95 = arith.constant 0 : index
    %c0_96 = arith.constant 0 : index
    %c0_97 = arith.constant 0 : index
    %163 = vector.load %arg13[%c0_95, %c0_96, %c0_97] : memref<1x32x256xf32, #tpu.memory_space<vmem>>, vector<1x32x256xf32>
    %164 = vector.shape_cast %163 : vector<1x32x256xf32> to vector<32x256xf32>
    %165 = vector.shape_cast %162 : vector<32x256xf32> to vector<1x32x256xf32>
    tpu.vector_store %arg13[%c0_95, %c0_96, %c0_97], %165 {strides = array<i32>} : memref<1x32x256xf32, #tpu.memory_space<vmem>>, vector<1x32x256xf32>,
    return
  }
  func.func @transform_0(%arg0: i32) -> (i32, i32, i32) {
    %c0_i32 = arith.constant 0 : i32
    %c0_i32_0 = arith.constant 0 : i32
    %c0_i32_1 = arith.constant 0 : i32
    return %arg0, %c0_i32, %c0_i32_0 : i32, i32, i32
  }
  func.func @transform_1(%arg0: i32) -> (i32, i32) {
    %c0_i32 = arith.constant 0 : i32
    %c0_i32_0 = arith.constant 0 : i32
    %c0_i32_1 = arith.constant 0 : i32
    return %c0_i32, %c0_i32_0 : i32, i32
  }
  func.func @transform_2(%arg0: i32) -> (i32, i32) {
    %c0_i32 = arith.constant 0 : i32
    %c0_i32_0 = arith.constant 0 : i32
    %c0_i32_1 = arith.constant 0 : i32
    return %c0_i32, %c0_i32_0 : i32, i32
  }
  func.func @transform_3(%arg0: i32) -> (i32, i32) {
    %c0_i32 = arith.constant 0 : i32
    %c0_i32_0 = arith.constant 0 : i32
    %c0_i32_1 = arith.constant 0 : i32
    return %c0_i32, %c0_i32_0 : i32, i32
  }
  func.func @transform_4(%arg0: i32) -> (i32, i32) {
    %c0_i32 = arith.constant 0 : i32
    %c0_i32_0 = arith.constant 0 : i32
    %c0_i32_1 = arith.constant 0 : i32
    return %c0_i32, %c0_i32_0 : i32, i32
  }
  func.func @transform_5(%arg0: i32) -> (i32, i32) {
    %c0_i32 = arith.constant 0 : i32
    %c0_i32_0 = arith.constant 0 : i32
    %c0_i32_1 = arith.constant 0 : i32
    return %c0_i32, %c0_i32_0 : i32, i32
  }
  func.func @transform_6(%arg0: i32) -> (i32, i32) {
    %c0_i32 = arith.constant 0 : i32
    %c0_i32_0 = arith.constant 0 : i32
    %c0_i32_1 = arith.constant 0 : i32
    return %c0_i32, %c0_i32_0 : i32, i32
  }
  func.func @transform_7(%arg0: i32) -> (i32, i32) {
    %c0_i32 = arith.constant 0 : i32
    %c0_i32_0 = arith.constant 0 : i32
    %c0_i32_1 = arith.constant 0 : i32
    return %c0_i32, %c0_i32_0 : i32, i32
  }
  func.func @transform_8(%arg0: i32) -> (i32, i32) {
    %c0_i32 = arith.constant 0 : i32
    %c0_i32_0 = arith.constant 0 : i32
    %c0_i32_1 = arith.constant 0 : i32
    return %c0_i32, %c0_i32_0 : i32, i32
  }
  func.func @transform_9(%arg0: i32) -> (i32, i32) {
    %c0_i32 = arith.constant 0 : i32
    %c0_i32_0 = arith.constant 0 : i32
    %c0_i32_1 = arith.constant 0 : i32
    return %c0_i32, %c0_i32_0 : i32, i32
  }
  func.func @transform_10(%arg0: i32) -> (i32, i32) {
    %c0_i32 = arith.constant 0 : i32
    %c0_i32_0 = arith.constant 0 : i32
    %c0_i32_1 = arith.constant 0 : i32
    return %c0_i32, %c0_i32_0 : i32, i32
  }
  func.func @transform_11(%arg0: i32) -> (i32, i32) {
    %c0_i32 = arith.constant 0 : i32
    %c0_i32_0 = arith.constant 0 : i32
    %c0_i32_1 = arith.constant 0 : i32
    return %c0_i32, %c0_i32_0 : i32, i32
  }
  func.func @transform_12(%arg0: i32) -> (i32, i32, i32) {
    %c0_i32 = arith.constant 0 : i32
    %c0_i32_0 = arith.constant 0 : i32
    %c0_i32_1 = arith.constant 0 : i32
    return %arg0, %c0_i32, %c0_i32_0 : i32, i32, i32
  }
}

</mosaic_0001>

<bundles_post_ra>
// kernel: irb_nof1_forward.1
= control target key start
LH: loop header
LB: loop body
LE: loop exit
PB: predicated region body
PF: predicated region fallthrough
CT: control target
= control target key end

     0   :  { %s2525_s21 = smov 0   ;;  %s3418_s0 = inlined_call_operand.vmem [shape: f32[2,32,256], index: 0, kind: input, shape index: {}]   ;;  %s3419_s1 = inlined_call_operand.vmem [shape: f32[8,256], index: 1, kind: input, shape index: {}]   ;;  %s3420_s2 = inlined_call_operand.vmem [shape: bf16[16,288], index: 2, kind: input, shape index: {}]   ;;  %s3421_s3 = inlined_call_operand.vmem [shape: f32[16,1], index: 3, kind: input, shape index: {}]   ;;  %s3422_s4 = inlined_call_operand.vmem [shape: bf16[32,144], index: 4, kind: input, shape index: {}]   ;;  %s3423_s5 = inlined_call_operand.vmem [shape: f32[32,1], index: 5, kind: input, shape index: {}]   ;;  %s3424_s6 = inlined_call_operand.vmem [shape: bf16[32,32], index: 6, kind: input, shape index: {}]   ;;  %s3425_s7 = inlined_call_operand.vmem [shape: f32[32,1], index: 7, kind: input, shape index: {}]   ;;  %s3426_s8 = inlined_call_operand.vmem [shape: f32[32,2], index: 8, kind: input, shape index: {}]   ;;  %s3427_s9 = inlined_call_operand.vmem [shape: f32[1,2], index: 9, kind: input, shape index: {}]   ;;  %s3428_s10 = inlined_call_operand.vmem [shape: f32[32,2], index: 10, kind: input, shape index: {}]   ;;  %s3429_s11 = inlined_call_operand.vmem [shape: f32[32,1], index: 11, kind: input, shape index: {}]   ;;  %s3430_s12 = inlined_call_operand.vmem [shape: f32[2,32,256], index: 12, kind: output, shape index: {}]  }
   0x1 LB: > { %s2035_s22 = sadd.s32 4294967295, %s2449_s21   ;;  %p2039_p0 = scmp.ge.s32.totalorder %s2449_s21, 1  ;;  %s2449_s21 = sphi %s2525_s21, %s22_s21  }
   0x2   : > { %p362_p1 = scmp.lt.s32.totalorder %s2449_s21, 3 }
   0x4   : > { %p363_p2 = pnand %p2039_p0, %p362_p1 }
   0x5   : > { %p404_p3 = scmp.lt.s32.totalorder (!%p363_p2), %s2035_s22, 1  ;;  %s2451_s27 = smov (!%p363_p2), 112  }
   0x6   : > { %366 = sbr.rel (%p363_p2) target bundleno = 1560 (0x618), region = 68  ;;  %s2452_s28 = smov (!%p363_p2), 1  }
   0x7   : > { %s2453_s29 = smov (!%p363_p2), 113   ;;  %s2454_s30 = smov (!%p363_p2), 15  }
   0x8   : > { %s2455_s13 = smov (!%p363_p2), 127   ;;  %s2456_s14 = smov (!%p363_p2), 111  }
   0x9   : > { %s2457_s17 = smov (!%p363_p2), 16   ;;  %s2458_s25 = smov (!%p363_p2), 17  }
   0xb   : > { %s3432_s22 = smov (!%p404_p3, %s2035_s22), 1  ;;  %v439_v10 = vlaneseq  ;;  %v2049_v13 = vld [vmem:[%s3419_s1 + $0x6] ss:$8 sm:$0x3]  ;;  %vm1063_vm7 = vcmask 261120   ;;  %vm1529_vm13 = vcmask 130048  }
   0xc   : > { %s2326_s23 = sshll.u32 %s3432_s22, 6  ;;  %v748_v14 = vperm.slane %v2049_v13, 0  ;;  %v749_v15 = vperm.slane %v2049_v13, 1  ;;  %v2046_v43 = vld [vmem:[%s3419_s1 + $0x3] ss:$8 sm:$0x3] }
   0xd   : > { %s2541_s26 = scalar_lea.vmem %s3418_s0, %s2326_s23  ;;  %v2651_v11 = vand.u32 127, %v439_v10  ;;  %v2705_v49 = vperm.slane %v2046_v43, 0  ;;  %v2707_v50 = vperm.slane %v2046_v43, 1  ;;  %v2048_v62 = vld [vmem:[%s3419_s1 + $0x5] ss:$8 sm:$0x3]  ;;  %s413_s19 = scalar_lea.vmem %s3430_s12, %s2326_s23 }
   0xe   : > { %v2544_v0 = vld [vmem:[%s2541_s26 + $0x28] sm:$0xff]  ;;  %v2547_v1 = vld [vmem:[%s2541_s26 + $0x20] sm:$0xff]  ;;  %v2559_v3 = vld [vmem:[%s2541_s26 + $0x38] sm:$0xff]  ;;  %v2737_v13 = vperm.slane %v2048_v62, 1 }
   0xf   : > { %732 = vrot.lane.b32.xlu1 %v2544_v0, %s2451_s27  ;;  %724 = vrot.lane.b32.xlu0 %v2547_v1, %s2451_s27  ;;  %v2554_v2 = vld [vmem:[%s2541_s26] sm:$0xff]  ;;  %v2562_v4 = vld [vmem:[%s2541_s26 + $0x30] sm:$0xff]  ;;  %vm736_vm0 = vcmp.lt.s32.totalorder %v2651_v11, 112  ;;  %vm584_vm1 = vcmp.lt.s32.totalorder %v2651_v11, 1  ;;  %vm688_vm2 = vcmp.lt.s32.totalorder %v2651_v11, 113  ;;  %vm536_vm3 = vcmp.lt.s32.totalorder %v2651_v11, 15 }
  0x10   : > { %720 = vrot.lane.b32.xlu2 %v2554_v2, %s2451_s27  ;;  %v2565_v5 = vld [vmem:[%s2541_s26 + $0x10] sm:$0xff]  ;;  %v2574_v6 = vld [vmem:[%s2541_s26 + $0x18] sm:$0xff]  ;;  %v2577_v7 = vld [vmem:[%s2541_s26 + $0x8] sm:$0xff]  ;;  %vm640_vm4 = vcmp.lt.s32.totalorder %v2651_v11, 127  ;;  %vm784_vm5 = vcmp.lt.s32.totalorder %v2651_v11, 111  ;;  %vm488_vm6 = vcmp.lt.s32.totalorder %v2651_v11, 16 }
  0x11   : > { %vm441_vm8 = vcmp.lt.s32.totalorder %v2651_v11, 17  ;;  %v1400_v11 = vld [vmem:[%s3423_s5 + $0x18] sm:$0xff] }
  0x17   : > { %734 = vrot.lane.b32.xlu1 %v2559_v3, %s2451_s27  ;;  %726 = vrot.lane.b32.xlu0 %v2562_v4, %s2451_s27 }
  0x18   : > { %722 = vrot.lane.b32.xlu2 %v2565_v5, %s2451_s27 }
  0x1f   : > { %730 = vrot.lane.b32.xlu1 %v2574_v6, %s2451_s27  ;;  %728 = vrot.lane.b32.xlu0 %v2577_v7, %s2451_s27 }
  0x20   : > { %572 = vrot.lane.b32.xlu2 %v2547_v1, %s2452_s28 }
  0x27   : > { %580 = vrot.lane.b32.xlu1 %v2544_v0, %s2452_s28  ;;  %574 = vrot.lane.b32.xlu0 %v2562_v4, %s2452_s28 }
  0x28   : > { %582 = vrot.lane.b32.xlu2 %v2559_v3, %s2452_s28 }
  0x2f   : > { %678 = vrot.lane.b32.xlu1 %v2562_v4, %s2453_s29  ;;  %676 = vrot.lane.b32.xlu0 %v2547_v1, %s2453_s29 }
  0x30   : > { %684 = vrot.lane.b32.xlu2 %v2544_v0, %s2453_s29 }
  0x37   : > { %686 = vrot.lane.b32.xlu0 %v2559_v3, %s2453_s29  ;;  %568 = vrot.lane.b32.xlu1 %v2554_v2, %s2452_s28 }
  0x38   : > { %570 = vrot.lane.b32.xlu2 %v2565_v5, %s2452_s28 }
  0x3f   : > { %576 = vrot.lane.b32.xlu0 %v2577_v7, %s2452_s28  ;;  %578 = vrot.lane.b32.xlu1 %v2574_v6, %s2452_s28 }
  0x40   : > { %672 = vrot.lane.b32.xlu2 %v2554_v2, %s2453_s29 }
  0x47   : > { %674 = vrot.lane.b32.xlu0 %v2565_v5, %s2453_s29  ;;  %680 = vrot.lane.b32.xlu1 %v2577_v7, %s2453_s29 }
  0x48   : > { %682 = vrot.lane.b32.xlu2 %v2574_v6, %s2453_s29 }
  0x4f   : > { %524 = vrot.lane.b32.xlu0 %v2547_v1, %s2454_s30  ;;  %526 = vrot.lane.b32.xlu1 %v2562_v4, %s2454_s30 }
  0x50   : > { %532 = vrot.lane.b32.xlu2 %v2544_v0, %s2454_s30 }
  0x57   : > { %534 = vrot.lane.b32.xlu0 %v2559_v3, %s2454_s30  ;;  %628 = vrot.lane.b32.xlu1 %v2547_v1, %s2455_s13 }
  0x58   : > { %630 = vrot.lane.b32.xlu2 %v2562_v4, %s2455_s13 }
  0x5f   : > { %636 = vrot.lane.b32.xlu0 %v2544_v0, %s2455_s13  ;;  %638 = vrot.lane.b32.xlu1 %v2559_v3, %s2455_s13 }
  0x60   : > { %772 = vrot.lane.b32.xlu2 %v2547_v1, %s2456_s14 }
  0x67   : > { %774 = vrot.lane.b32.xlu0 %v2562_v4, %s2456_s14  ;;  %780 = vrot.lane.b32.xlu1 %v2544_v0, %s2456_s14 }
  0x68   : > { %782 = vrot.lane.b32.xlu2 %v2559_v3, %s2456_s14 }
  0x6a   : > { %v721_v8 = vpop.permute.xlu2 %720 }
  0x6f   : > { %520 = vrot.lane.b32.xlu0 %v2554_v2, %s2454_s30  ;;  %522 = vrot.lane.b32.xlu1 %v2565_v5, %s2454_s30 }
  0x70   : > { %528 = vrot.lane.b32.xlu2 %v2577_v7, %s2454_s30 }
  0x72   : > { %v723_v9 = vpop.permute.xlu2 %722 }
  0x77   : > { %530 = vrot.lane.b32.xlu0 %v2574_v6, %s2454_s30  ;;  %624 = vrot.lane.b32.xlu1 %v2554_v2, %s2455_s13 }
  0x78   : > { %626 = vrot.lane.b32.xlu2 %v2565_v5, %s2455_s13 }
  0x7a   : > { %v2653_v12 = vpop.permute.xlu2 %572 }
  0x7f   : > { %632 = vrot.lane.b32.xlu0 %v2577_v7, %s2455_s13  ;;  %634 = vrot.lane.b32.xlu1 %v2574_v6, %s2455_s13 }
  0x80   : > { %768 = vrot.lane.b32.xlu2 %v2554_v2, %s2456_s14 }
  0x81   : > { %v733_v16 = vpop.permute.xlu1 %732  ;;  %v725_v17 = vpop.permute.xlu0 %724 }
  0x82   : > { %v739_v18 = vsel %vm736_vm0, %v725_v17, %v733_v16  ;;  %v743_v19 = vsel %vm736_vm0, %v733_v16, %v725_v17  ;;  %v583_v22 = vpop.permute.xlu2 %582 }
  0x83   : > { %v756_v20 = vmul.f32 %v748_v14, %v739_v18  ;;  %v757_v21 = vmul.f32 %v749_v15, %v743_v19 }
  0x85   : > { %v762_v23 = vpack.c.bf16 %v757_v21, %v756_v20 }
  0x87   : > { %766 = vst [vmem:[#allocation2 + $0xf0] sm:$0xff] %v762_v23  ;;  %770 = vrot.lane.b32.xlu0 %v2565_v5, %s2456_s14  ;;  %776 = vrot.lane.b32.xlu1 %v2577_v7, %s2456_s14 }
  0x88   : > { %778 = vrot.lane.b32.xlu2 %v2574_v6, %s2456_s14 }
  0x89   : > { %v735_v24 = vpop.permute.xlu1 %734  ;;  %v727_v25 = vpop.permute.xlu0 %726 }
  0x8a   : > { %v740_v26 = vsel %vm736_vm0, %v727_v25, %v735_v24  ;;  %v744_v27 = vsel %vm736_vm0, %v735_v24, %v727_v25  ;;  %v2679_v30 = vpop.permute.xlu2 %684 }
  0x8b   : > { %v758_v28 = vmul.f32 %v748_v14, %v740_v26  ;;  %v759_v29 = vmul.f32 %v749_v15, %v744_v27 }
  0x8d   : > { %v763_v31 = vpack.c.bf16 %v759_v29, %v758_v28 }
  0x8e   : > { %v2185_v46 = vld [vmem:[#allocation2 + $0xf0] sm:$0xf] }
  0x8f   : > { %767 = vst [vmem:[#allocation2 + $0xf8] sm:$0xff] %v763_v31  ;;  %476 = vrot.lane.b32.xlu0 %v2547_v1, %s2457_s17  ;;  %478 = vrot.lane.b32.xlu1 %v2562_v4, %s2457_s17 }
  0x90   : > { %484 = vrot.lane.b32.xlu2 %v2544_v0, %s2457_s17 }
  0x91   : > { %v731_v32 = vpop.permute.xlu1 %730  ;;  %v729_v33 = vpop.permute.xlu0 %728 }
  0x92   : > { %v738_v34 = vsel %vm736_vm0, %v723_v9, %v731_v32  ;;  %v742_v35 = vsel %vm736_vm0, %v731_v32, %v723_v9  ;;  %v737_v36 = vsel %vm736_vm0, %v721_v8, %v729_v33  ;;  %v741_v37 = vsel %vm736_vm0, %v729_v33, %v721_v8  ;;  %v2695_v42 = vpop.permute.xlu2 %570 }
  0x93   : > { %v754_v38 = vmul.f32 %v748_v14, %v738_v34  ;;  %v755_v39 = vmul.f32 %v749_v15, %v742_v35  ;;  %v752_v40 = vmul.f32 %v748_v14, %v737_v36  ;;  %v753_v41 = vmul.f32 %v749_v15, %v741_v37 }
  0x95   : > { %v761_v44 = vpack.c.bf16 %v755_v39, %v754_v38  ;;  %v760_v45 = vpack.c.bf16 %v753_v41, %v752_v40 }
  0x96   : > { %v2362_v47 = vld [vmem:[#allocation2 + $0xf4] sm:$0xf0] }
  0x97   : > { %765 = vst [vmem:[#allocation2 + $0xe8] sm:$0xff] %v761_v44  ;;  %486 = vrot.lane.b32.xlu0 %v2559_v3, %s2457_s17  ;;  %472 = vrot.lane.b32.xlu1 %v2554_v2, %s2457_s17  ;;  %v2186_v48 = vor.u32 %v2362_v47, %v2185_v46 }
  0x98   : > { %764 = vst [vmem:[#allocation2 + $0xe0] sm:$0xff] %v760_v45  ;;  %474 = vrot.lane.b32.xlu2 %v2565_v5, %s2457_s17 }
  0x99   : > { %1081 = vmatpush.bf16.msra.mxu1 %v2186_v48  ;;  %v581_v51 = vpop.permute.xlu1 %580  ;;  %v575_v52 = vpop.permute.xlu0 %574 }
  0x9a   : > { %v587_v53 = vsel %vm584_vm1, %v2653_v12, %v581_v51  ;;  %v591_v54 = vsel %vm584_vm1, %v581_v51, %v2653_v12  ;;  %v588_v55 = vsel %vm584_vm1, %v575_v52, %v583_v22  ;;  %v592_v56 = vsel %vm584_vm1, %v583_v22, %v575_v52  ;;  %v2725_v61 = vpop.permute.xlu2 %672 }
  0x9b   : > { %v604_v57 = vmul.f32 %v2705_v49, %v591_v54  ;;  %v605_v58 = vmul.f32 %v2707_v50, %v587_v53  ;;  %v606_v59 = vmul.f32 %v2705_v49, %v592_v56  ;;  %v607_v60 = vmul.f32 %v2707_v50, %v588_v55 }
  0x9c   : > { %v2735_v12 = vperm.slane %v2048_v62, 0 }
  0x9d   : > { %v610_v63 = vpack.c.bf16 %v605_v58, %v604_v57  ;;  %v611_v8 = vpack.c.bf16 %v607_v60, %v606_v59 }
  0x9e   : > { %v2360_v9 = vld [vmem:[#allocation2 + $0xe4] sm:$0xf0] }
  0x9f   : > { %614 = vst [vmem:[#allocation2 + $0x70] sm:$0xff] %v610_v63  ;;  %480 = vrot.lane.b32.xlu0 %v2577_v7, %s2457_s17  ;;  %482 = vrot.lane.b32.xlu1 %v2574_v6, %s2457_s17  ;;  %v2177_v10 = vld [vmem:[#allocation2 + $0xe0] sm:$0xf] }
  0xa0   : > { %615 = vst [vmem:[#allocation2 + $0x78] sm:$0xff] %v611_v8  ;;  %v2178_v14 = vor.u32 %v2360_v9, %v2177_v10  ;;  %427 = vrot.lane.b32.xlu2 %v2547_v1, %s2458_s25  ;;  %v2045_v8 = vld [vmem:[%s3419_s1 + $0x2] ss:$8 sm:$0x3] }
  0xa1   : > { %v679_v15 = vpop.permute.xlu1 %678  ;;  %v677_v16 = vpop.permute.xlu0 %676 }
  0xa2   : > { %1082 = vmatpush.bf16.msra.mxu1 %v2178_v14  ;;  %v691_v17 = vsel %vm688_vm2, %v677_v16, %v2679_v30  ;;  %v695_v18 = vsel %vm688_vm2, %v2679_v30, %v677_v16  ;;  %v683_v21 = vpop.permute.xlu2 %682  ;;  %v2805_v16 = vperm.slane %v2045_v8, 0 }
  0xa3   : > { %v708_v19 = vmul.f32 %v2735_v12, %v691_v17  ;;  %v709_v20 = vmul.f32 %v2737_v13, %v695_v18 }
  0xa5   : > { %v714_v22 = vpack.c.bf16 %v709_v20, %v708_v19 }
  0xa6   : > { %v2121_v23 = vld [vmem:[#allocation2 + $0x70] sm:$0xf]  ;;  %v2345_v24 = vld [vmem:[#allocation2 + $0x74] sm:$0xf] }
  0xa7   : > { %718 = vst [vmem:[#allocation2 + $0xd0] sm:$0xff] %v714_v22  ;;  %429 = vrot.lane.b32.xlu0 %v2562_v4, %s2458_s25  ;;  %435 = vrot.lane.b32.xlu1 %v2544_v0, %s2458_s25  ;;  %v2346_v25 = vld [vmem:[#allocation2 + $0x74] sm:$0xf0]  ;;  %v2123_v26 = vld [vmem:[#allocation2 + $0x78] sm:$0xf0] }
  0xa8   : > { %v2122_v27 = vor.u32 %v2346_v25, %v2121_v23  ;;  %v2126_v28 = vor.u32 %v2345_v24, %v2123_v26  ;;  %437 = vrot.lane.b32.xlu2 %v2559_v3, %s2458_s25 }
  0xa9   : > { %v687_v29 = vpop.permute.xlu0 %686  ;;  %v569_v30 = vpop.permute.xlu1 %568 }
  0xaa   : > { %v692_v31 = vsel %vm688_vm2, %v679_v15, %v687_v29  ;;  %v696_v32 = vsel %vm688_vm2, %v687_v29, %v679_v15  ;;  %1067 = vmatpush.bf16.msra.mxu0 %v2122_v27  ;;  %1109 = vmatpush.bf16.msra.mxu3 %v2126_v28  ;;  %v533_v35 = vpop.permute.xlu2 %532 }
  0xab   : > { %v710_v33 = vmul.f32 %v2735_v12, %v692_v31  ;;  %v711_v34 = vmul.f32 %v2737_v13, %v696_v32 }
  0xad   : > { %v715_v36 = vpack.c.bf16 %v711_v34, %v710_v33 }
  0xae   : > { %v2169_v53 = vld [vmem:[#allocation2 + $0xd0] sm:$0xf] }
  0xaf   : > { %719 = vst [vmem:[#allocation2 + $0xd8] sm:$0xff] %v715_v36  ;;  %423 = vrot.lane.b32.xlu0 %v2554_v2, %s2458_s25  ;;  %425 = vrot.lane.b32.xlu1 %v2565_v5, %s2458_s25 }
  0xb0   : > { %431 = vrot.lane.b32.xlu2 %v2577_v7, %s2458_s25 }
  0xb1   : > { %v577_v37 = vpop.permute.xlu0 %576  ;;  %v579_v38 = vpop.permute.xlu1 %578 }
  0xb2   : > { %v585_v39 = vsel %vm584_vm1, %v569_v30, %v577_v37  ;;  %v589_v40 = vsel %vm584_vm1, %v577_v37, %v569_v30  ;;  %v586_v41 = vsel %vm584_vm1, %v2695_v42, %v579_v38  ;;  %v590_v43 = vsel %vm584_vm1, %v579_v38, %v2695_v42  ;;  %v2781_v48 = vpop.permute.xlu2 %630  ;;  %v2047_v37 = vld [vmem:[%s3419_s1 + $0x4] ss:$8 sm:$0x3] }
  0xb3   : > { %v600_v44 = vmul.f32 %v2705_v49, %v589_v40  ;;  %v601_v45 = vmul.f32 %v2707_v50, %v585_v39  ;;  %v602_v46 = vmul.f32 %v2705_v49, %v590_v43  ;;  %v603_v47 = vmul.f32 %v2707_v50, %v586_v41 }
  0xb4   : > { %v2825_v40 = vperm.slane %v2047_v37, 0  ;;  %v2827_v41 = vperm.slane %v2047_v37, 1 }
  0xb5   : > { %v608_v51 = vpack.c.bf16 %v601_v45, %v600_v44  ;;  %v609_v52 = vpack.c.bf16 %v603_v47, %v602_v46 }
  0xb6   : > { %v2358_v54 = vld [vmem:[#allocation2 + $0xd4] sm:$0xf0] }
  0xb7   : > { %612 = vst [vmem:[#allocation2 + $0x60] sm:$0xff] %v608_v51  ;;  %433 = vrot.lane.b32.xlu0 %v2574_v6, %s2458_s25  ;;  %v2170_v55 = vor.u32 %v2358_v54, %v2169_v53 }
  0xb8   : > { %613 = vst [vmem:[#allocation2 + $0x68] sm:$0xff] %v609_v52 }
  0xb9   : > { %v675_v42 = vpop.permute.xlu0 %674  ;;  %v681_v56 = vpop.permute.xlu1 %680  ;;  %1083 = vmatpush.bf16.msra.mxu1 %v2170_v55 }
  0xba   : > { %v689_v49 = vsel %vm688_vm2, %v2725_v61, %v681_v56  ;;  %v693_v50 = vsel %vm688_vm2, %v681_v56, %v2725_v61  ;;  %v690_v57 = vsel %vm688_vm2, %v675_v42, %v683_v21  ;;  %v694_v58 = vsel %vm688_vm2, %v683_v21, %v675_v42  ;;  %v2802_v9 = vpop.permute.xlu2 %772  ;;  %v2050_v42 = vld [vmem:[%s3419_s1 + $0x7] ss:$8 sm:$0x3] }
  0xbb   : > { %v704_v59 = vmul.f32 %v2735_v12, %v689_v49  ;;  %v705_v60 = vmul.f32 %v2737_v13, %v693_v50  ;;  %v706_v62 = vmul.f32 %v2735_v12, %v690_v57  ;;  %v707_v63 = vmul.f32 %v2737_v13, %v694_v58 }
  0xbc   : > { %v2807_v12 = vperm.slane %v2045_v8, 1 }
  0xbd   : > { %v712_v61 = vpack.c.bf16 %v705_v60, %v704_v59  ;;  %v713_v10 = vpack.c.bf16 %v707_v63, %v706_v62  ;;  %v2847_v59 = vperm.slane %v2050_v42, 0  ;;  %v2849_v60 = vperm.slane %v2050_v42, 1 }
  0xbe   : > { %v2113_v14 = vld [vmem:[#allocation2 + $0x60] sm:$0xf]  ;;  %v2343_v15 = vld [vmem:[#allocation2 + $0x64] sm:$0xf] }
  0xbf   : > { %716 = vst [vmem:[#allocation2 + $0xc0] sm:$0xff] %v712_v61  ;;  %v2344_v17 = vld [vmem:[#allocation2 + $0x64] sm:$0xf0]  ;;  %v2115_v18 = vld [vmem:[#allocation2 + $0x68] sm:$0xf0] }
  0xc0   : > { %717 = vst [vmem:[#allocation2 + $0xc8] sm:$0xff] %v713_v10  ;;  %v2114_v13 = vor.u32 %v2344_v17, %v2113_v14  ;;  %v2118_v19 = vor.u32 %v2343_v15, %v2115_v18 }
  0xc1   : > { %v525_v20 = vpop.permute.xlu0 %524  ;;  %v527_v21 = vpop.permute.xlu1 %526 }
  0xc2   : > { %1068 = vmatpush.bf16.msra.mxu0 %v2114_v13  ;;  %1110 = vmatpush.bf16.msra.mxu3 %v2118_v19  ;;  %v539_v22 = vsel %vm536_vm3, %v525_v20, %v533_v35  ;;  %v543_v23 = vsel %vm536_vm3, %v533_v35, %v525_v20  ;;  %v783_v26 = vpop.permute.xlu2 %782 }
  0xc3   : > { %v556_v24 = vmul.f32 %v2805_v16, %v543_v23  ;;  %v557_v25 = vmul.f32 %v2807_v12, %v539_v22  ;;  %v618_v22 = vpack.c.bf16 %v2544_v0, %v2547_v1 }
  0xc5   : > { %v562_v27 = vpack.c.bf16 %v557_v25, %v556_v24  ;;  %622 = vst [vmem:[#allocation2 + $0x90] sm:$0xff] %v618_v22 }
  0xc6   : > { %v2161_v28 = vld [vmem:[#allocation2 + $0xc0] sm:$0xf] }
  0xc7   : > { %566 = vst [vmem:[#allocation2 + $0x50] sm:$0xff] %v562_v27  ;;  %v2356_v29 = vld [vmem:[#allocation2 + $0xc4] sm:$0xf0] }
  0xc8   : > { %v2162_v30 = vor.u32 %v2356_v29, %v2161_v28  ;;  %v617_v28 = vpack.c.bf16 %v2574_v6, %v2565_v5 }
  0xc9   : > { %v535_v31 = vpop.permute.xlu0 %534  ;;  %v629_v32 = vpop.permute.xlu1 %628 }
  0xca   : > { %v540_v33 = vsel %vm536_vm3, %v527_v21, %v535_v31  ;;  %v544_v34 = vsel %vm536_vm3, %v535_v31, %v527_v21  ;;  %1084 = vmatpush.bf16.msra.mxu1 %v2162_v30  ;;  %v529_v39 = vpop.permute.xlu2 %528  ;;  %621 = vst [vmem:[#allocation2 + $0x88] sm:$0xff] %v617_v28 }
  0xcb   : > { %v558_v35 = vmul.f32 %v2805_v16, %v544_v34  ;;  %v559_v36 = vmul.f32 %v2807_v12, %v540_v33 }
  0xcd   : > { %v563_v38 = vpack.c.bf16 %v559_v36, %v558_v35 }
  0xce   : > { %v2105_v50 = vld [vmem:[#allocation2 + $0x50] sm:$0xf]  ;;  %v2341_v58 = vld [vmem:[#allocation2 + $0x54] sm:$0xf] }
  0xcf   : > { %567 = vst [vmem:[#allocation2 + $0x58] sm:$0xff] %v563_v38 }
  0xd1   : > { %v637_v43 = vpop.permute.xlu0 %636  ;;  %v639_v44 = vpop.permute.xlu1 %638 }
  0xd2   : > { %v643_v45 = vsel %vm640_vm4, %v629_v32, %v637_v43  ;;  %v647_v46 = vsel %vm640_vm4, %v637_v43, %v629_v32  ;;  %v644_v47 = vsel %vm640_vm4, %v2781_v48, %v639_v44  ;;  %v648_v51 = vsel %vm640_vm4, %v639_v44, %v2781_v48  ;;  %v627_v8 = vpop.permute.xlu2 %626 }
  0xd3   : > { %v660_v52 = vmul.f32 %v2825_v40, %v643_v45  ;;  %v661_v53 = vmul.f32 %v2827_v41, %v647_v46  ;;  %v662_v54 = vmul.f32 %v2825_v40, %v644_v47  ;;  %v663_v55 = vmul.f32 %v2827_v41, %v648_v51 }
  0xd5   : > { %v666_v56 = vpack.c.bf16 %v661_v53, %v660_v52  ;;  %v667_v49 = vpack.c.bf16 %v663_v55, %v662_v54 }
  0xd6   : > { %v2342_v57 = vld [vmem:[#allocation2 + $0x54] sm:$0xf0]  ;;  %v2107_v48 = vld [vmem:[#allocation2 + $0x58] sm:$0xf0] }
  0xd7   : > { %670 = vst [vmem:[#allocation2 + $0xb0] sm:$0xff] %v666_v56  ;;  %v2106_v62 = vor.u32 %v2342_v57, %v2105_v50  ;;  %v2110_v63 = vor.u32 %v2341_v58, %v2107_v48 }
  0xd8   : > { %671 = vst [vmem:[#allocation2 + $0xb8] sm:$0xff] %v667_v49 }
  0xd9   : > { %v775_v61 = vpop.permute.xlu0 %774  ;;  %v781_v10 = vpop.permute.xlu1 %780  ;;  %1069 = vmatpush.bf16.msra.mxu0 %v2106_v62  ;;  %1111 = vmatpush.bf16.msra.mxu3 %v2110_v63 }
  0xda   : > { %v787_v14 = vsel %vm784_vm5, %v2802_v9, %v781_v10  ;;  %v791_v15 = vsel %vm784_vm5, %v781_v10, %v2802_v9  ;;  %v788_v17 = vsel %vm784_vm5, %v775_v61, %v783_v26  ;;  %v792_v18 = vsel %vm784_vm5, %v783_v26, %v775_v61 }
  0xdb   : > { %v804_v13 = vmul.f32 %v2847_v59, %v787_v14  ;;  %v805_v19 = vmul.f32 %v2849_v60, %v791_v15  ;;  %v806_v20 = vmul.f32 %v2847_v59, %v788_v17  ;;  %v807_v21 = vmul.f32 %v2849_v60, %v792_v18 }
  0xdc   : > { %v619_v9 = vpack.c.bf16 %v2559_v3, %v2562_v4  ;;  %v616_v26 = vpack.c.bf16 %v2577_v7, %v2554_v2  ;;  %v769_v3 = vpop.permute.xlu2 %768 }
  0xdd   : > { %v810_v23 = vpack.c.bf16 %v805_v19, %v804_v13  ;;  %v811_v24 = vpack.c.bf16 %v807_v21, %v806_v20  ;;  %v2044_v13 = vld [vmem:[%s3419_s1 + $0x1] ss:$8 sm:$0x3] }
  0xde   : > { %v2153_v25 = vld [vmem:[#allocation2 + $0xb0] sm:$0xf]  ;;  %623 = vst [vmem:[#allocation2 + $0x98] sm:$0xff] %v619_v9  ;;  %v2913_v22 = vperm.slane %v2044_v13, 0  ;;  %v2915_v9 = vperm.slane %v2044_v13, 1 }
  0xdf   : > { %814 = vst [vmem:[#allocation2 + $0x110] sm:$0xff] %v810_v23  ;;  %v2354_v27 = vld [vmem:[#allocation2 + $0xb4] sm:$0xf0]  ;;  %v2137_v23 = vld [vmem:[#allocation2 + $0x90] sm:$0xf] }
  0xe0   : > { %815 = vst [vmem:[#allocation2 + $0x118] sm:$0xff] %v811_v24  ;;  %v2154_v29 = vor.u32 %v2354_v27, %v2153_v25 }
  0xe1   : > { %v521_v30 = vpop.permute.xlu0 %520  ;;  %v523_v31 = vpop.permute.xlu1 %522  ;;  %620 = vst [vmem:[#allocation2 + $0x80] sm:$0xff] %v616_v26 }
  0xe2   : > { %1085 = vmatpush.bf16.msra.mxu1 %v2154_v29  ;;  %v537_v0 = vsel %vm536_vm3, %v521_v30, %v529_v39  ;;  %v541_v1 = vsel %vm536_vm3, %v529_v39, %v521_v30 }
  0xe3   : > { %v552_v2 = vmul.f32 %v2805_v16, %v541_v1  ;;  %v553_v4 = vmul.f32 %v2807_v12, %v537_v0 }
  0xe4   : > { %v779_v39 = vpop.permute.xlu2 %778 }
  0xe5   : > { %v560_v5 = vpack.c.bf16 %v553_v4, %v552_v2  ;;  %v2350_v25 = vld [vmem:[#allocation2 + $0x94] sm:$0xf0]  ;;  %v2187_v4 = vld [vmem:[#allocation2 + $0xf8] sm:$0xf0] }
  0xe6   : > { %v2201_v6 = vld [vmem:[#allocation2 + $0x110] sm:$0xf]  ;;  %v2138_v30 = vor.u32 %v2350_v25, %v2137_v23  ;;  %v2353_v23 = vld [vmem:[#allocation2 + $0xb4] sm:$0xf] }
  0xe7   : > { %564 = vst [vmem:[#allocation2 + $0x40] sm:$0xff] %v560_v5  ;;  %v2366_v7 = vld [vmem:[#allocation2 + $0x114] sm:$0xf0] }
  0xe8   : > { %v2202_v32 = vor.u32 %v2366_v7, %v2201_v6  ;;  %v2129_v1 = vld [vmem:[#allocation2 + $0x80] sm:$0xf]  ;;  %v2365_v7 = vld [vmem:[#allocation2 + $0x114] sm:$0xf] }
  0xe9   : > { %v531_v33 = vpop.permute.xlu0 %530  ;;  %v625_v34 = vpop.permute.xlu1 %624 }
  0xea   : > { %v538_v35 = vsel %vm536_vm3, %v523_v31, %v531_v33  ;;  %v542_v36 = vsel %vm536_vm3, %v531_v33, %v523_v31  ;;  %1101 = vmatpush.bf16.msra.mxu2 %v2202_v32  ;;  %v2203_v32 = vld [vmem:[#allocation2 + $0x118] sm:$0xf0] }
  0xeb   : > { %v554_v37 = vmul.f32 %v2805_v16, %v542_v36  ;;  %v555_v38 = vmul.f32 %v2807_v12, %v538_v35  ;;  %v2361_v35 = vld [vmem:[#allocation2 + $0xf4] sm:$0xf] }
  0xec   : > { %v485_v58 = vpop.permute.xlu2 %484 }
  0xed   : > { %v561_v43 = vpack.c.bf16 %v555_v38, %v554_v37  ;;  %v2190_v38 = vor.u32 %v2361_v35, %v2187_v4 }
  0xee   : > { %v2097_v56 = vld [vmem:[#allocation2 + $0x40] sm:$0xf]  ;;  %v2339_v50 = vld [vmem:[#allocation2 + $0x44] sm:$0xf] }
  0xef   : > { %565 = vst [vmem:[#allocation2 + $0x48] sm:$0xff] %v561_v43  ;;  %v2179_v43 = vld [vmem:[#allocation2 + $0xe8] sm:$0xf0] }
  0xf1   : > { %v633_v44 = vpop.permute.xlu0 %632  ;;  %v635_v45 = vpop.permute.xlu1 %634 }
  0xf2   : > { %v641_v46 = vsel %vm640_vm4, %v625_v34, %v633_v44  ;;  %v645_v47 = vsel %vm640_vm4, %v633_v44, %v625_v34  ;;  %v642_v51 = vsel %vm640_vm4, %v627_v8, %v635_v45  ;;  %v646_v52 = vsel %vm640_vm4, %v635_v45, %v627_v8 }
  0xf3   : > { %v656_v16 = vmul.f32 %v2825_v40, %v641_v46  ;;  %v657_v12 = vmul.f32 %v2827_v41, %v645_v47  ;;  %v658_v53 = vmul.f32 %v2825_v40, %v642_v51  ;;  %v659_v54 = vmul.f32 %v2827_v41, %v646_v52  ;;  %v2359_v46 = vld [vmem:[#allocation2 + $0xe4] sm:$0xf] }
  0xf5   : > { %v664_v55 = vpack.c.bf16 %v657_v12, %v656_v16  ;;  %v665_v42 = vpack.c.bf16 %v659_v54, %v658_v53  ;;  %v2061_v53 = vld [vmem:[%s3420_s2 + $0x8] sm:$0xf]  ;;  %v2330_v54 = vld [vmem:[%s3420_s2 + $0x10] sm:$0xf0] }
  0xf6   : > { %v2340_v49 = vld [vmem:[#allocation2 + $0x44] sm:$0xf0]  ;;  %v2099_v57 = vld [vmem:[#allocation2 + $0x48] sm:$0xf0] }
  0xf7   : > { %668 = vst [vmem:[#allocation2 + $0xa0] sm:$0xff] %v664_v55  ;;  %v2098_v48 = vor.u32 %v2340_v49, %v2097_v56  ;;  %v2102_v62 = vor.u32 %v2339_v50, %v2099_v57  ;;  %v2935_v49 = vor.u32 %v2330_v54, %v2061_v53  ;;  %v2171_v50 = vld [vmem:[#allocation2 + $0xd8] sm:$0xf0]  ;;  %v2328_v57 = vld [vmem:[%s3420_s2 + $0x4] sm:$0xf] }
  0xf8   : > { %669 = vst [vmem:[#allocation2 + $0xa8] sm:$0xff] %v665_v42  ;;  %v2182_v42 = vor.u32 %v2359_v46, %v2179_v43  ;;  %v856_v43 = vld [vmem:[%s3421_s3] sm:$0xff] }
  0xf9   : > { %v771_v63 = vpop.permute.xlu0 %770  ;;  %v777_v8 = vpop.permute.xlu1 %776  ;;  %1070 = vmatpush.bf16.msra.mxu0 %v2098_v48  ;;  %1112 = vmatpush.bf16.msra.mxu3 %v2102_v62  ;;  %v2357_v48 = vld [vmem:[#allocation2 + $0xd4] sm:$0xf] }
  0xfa   : > { %v785_v40 = vsel %vm784_vm5, %v769_v3, %v777_v8  ;;  %v789_v41 = vsel %vm784_vm5, %v777_v8, %v769_v3  ;;  %v786_v61 = vsel %vm784_vm5, %v771_v63, %v779_v39  ;;  %v790_v10 = vsel %vm784_vm5, %v779_v39, %v771_v63  ;;  %v2348_v3 = vld [vmem:[#allocation2 + $0x84] sm:$0xf0] }
  0xfb   : > { %v800_v14 = vmul.f32 %v2847_v59, %v785_v40  ;;  %v801_v15 = vmul.f32 %v2849_v60, %v789_v41  ;;  %v802_v17 = vmul.f32 %v2847_v59, %v786_v61  ;;  %v803_v18 = vmul.f32 %v2849_v60, %v790_v10  ;;  %v475_v60 = vpop.permute.xlu2 %474 }
  0xfc   : > { %v2130_v6 = vor.u32 %v2348_v3, %v2129_v1  ;;  %v2206_v39 = vor.u32 %v2365_v7, %v2203_v32  ;;  %v2174_v40 = vor.u32 %v2357_v48, %v2171_v50  ;;  %v2347_v50 = vld [vmem:[#allocation2 + $0x84] sm:$0xf] }
  0xfd   : > { %v808_v19 = vpack.c.bf16 %v801_v15, %v800_v14  ;;  %v809_v20 = vpack.c.bf16 %v803_v18, %v802_v17  ;;  %v2355_v15 = vld [vmem:[#allocation2 + $0xc4] sm:$0xf]  ;;  %v2163_v17 = vld [vmem:[#allocation2 + $0xc8] sm:$0xf0] }
  0xfe   : > { %v2145_v21 = vld [vmem:[#allocation2 + $0xa0] sm:$0xf]  ;;  %v2351_v32 = vld [vmem:[#allocation2 + $0xa4] sm:$0xf] }
  0xff   : > { %812 = vst [vmem:[#allocation2 + $0x100] sm:$0xff] %v808_v19  ;;  %v2352_v24 = vld [vmem:[#allocation2 + $0xa4] sm:$0xf0] }
 0x100   : > { %813 = vst [vmem:[#allocation2 + $0x108] sm:$0xff] %v809_v20  ;;  %v2146_v59 = vor.u32 %v2352_v24, %v2145_v21  ;;  %v450_v21 = vld [vmem:[%s3419_s1] ss:$8 sm:$0x3] }
 0x101   : > { %v477_v26 = vpop.permute.xlu0 %476  ;;  %v479_v27 = vpop.permute.xlu1 %478 }
 0x102   : > { %1086 = vmatpush.bf16.msra.mxu1 %v2146_v59  ;;  %v491_v28 = vsel %vm488_vm6, %v477_v26, %v485_v58  ;;  %v495_v29 = vsel %vm488_vm6, %v485_v58, %v477_v26  ;;  %v2055_v58 = vld [vmem:[%s3420_s2 + $0xc] sm:$0xf0]  ;;  %v2166_v59 = vor.u32 %v2355_v15, %v2163_v17 }
 0x103   : > { %v508_v31 = vmul.f32 %v2913_v22, %v495_v29  ;;  %v509_v0 = vmul.f32 %v2915_v9, %v491_v28  ;;  %v428_v12 = vpop.permute.xlu2 %427  ;;  %v2945_v62 = vor.u32 %v2328_v57, %v2055_v58  ;;  %v2131_v57 = vld [vmem:[#allocation2 + $0x88] sm:$0xf0] }
 0x105   : > { %v514_v2 = vpack.c.bf16 %v509_v0, %v508_v31 }
 0x106   : > { %1087 = vmatpush.bf16.msra.mxu1 %v2138_v30  ;;  %v2193_v5 = vld [vmem:[#allocation2 + $0x100] sm:$0xf]  ;;  %v2363_v47 = vld [vmem:[#allocation2 + $0x104] sm:$0xf] }
 0x107   : > { %518 = vst [vmem:[#allocation2 + $0x30] sm:$0xff] %v514_v2  ;;  %v2364_v33 = vld [vmem:[#allocation2 + $0x104] sm:$0xf0]  ;;  %v2195_v51 = vld [vmem:[#allocation2 + $0x108] sm:$0xf0] }
 0x108   : > { %v2194_v34 = vor.u32 %v2364_v33, %v2193_v5  ;;  %v2198_v56 = vor.u32 %v2363_v47, %v2195_v51  ;;  %v2147_v33 = vld [vmem:[#allocation2 + $0xa8] sm:$0xf0]  ;;  %v2459_v51 = vmov 0  }
 0x109   : > { %v487_v36 = vpop.permute.xlu0 %486  ;;  %v473_v37 = vpop.permute.xlu1 %472  ;;  %v2150_v47 = vor.u32 %v2351_v32, %v2147_v33  ;;  %2408 = vset.pattern.permute.xlu1 %v2459_v51  ;;  %2409 = vset.pattern.permute.xlu2 %v2459_v51 }
 0x10a   : > { %v492_v44 = vsel %vm488_vm6, %v479_v27, %v487_v36  ;;  %v496_v45 = vsel %vm488_vm6, %v487_v36, %v479_v27  ;;  %1102 = vmatpush.bf16.msra.mxu2 %v2194_v34  ;;  %1088 = vmatpush.bf16.msra.mxu1 %v2130_v6  ;;  %v2155_v27 = vld [vmem:[#allocation2 + $0xb8] sm:$0xf0] }
 0x10b   : > { %v510_v52 = vmul.f32 %v2913_v22, %v496_v45  ;;  %v511_v16 = vmul.f32 %v2915_v9, %v492_v44  ;;  %v438_v26 = vpop.permute.xlu2 %437  ;;  %v2158_v2 = vor.u32 %v2353_v23, %v2155_v27  ;;  %v857_v44 = vld [vmem:[%s3421_s3 + $0x8] sm:$0xff]  ;;  %860 = vperm.xlu1 %2408, %v856_v43   ;;  %2410 = vset.pattern.permute.xlu0 %v2459_v51 }
 0x10c   : > { %865 = vperm.xlu2 %2409, %v857_v44  }
 0x10d   : > { %v515_v55 = vpack.c.bf16 %v511_v16, %v510_v52  ;;  %2207 = vmatmul.msk.bf16.vlgmr.msra.gmra.mxu2 %vm1063_vm7, %v2935_v49  ;;  %1089 = vmatmul.bf16.vlgmr.msra.gmra.mxu1 %v2945_v62 }
 0x10e   : > { %1123 = vmatpush.bf16.msrb.mxu2 %v2190_v38  ;;  %1143 = vmatpush.bf16.msrb.mxu1 %v2206_v39  ;;  %v2337_v29 = vld [vmem:[#allocation2 + $0x34] sm:$0xf]  ;;  %v2139_v39 = vld [vmem:[#allocation2 + $0x98] sm:$0xf0] }
 0x10f   : > { %519 = vst [vmem:[#allocation2 + $0x38] sm:$0xff] %v515_v55  ;;  %v2349_v38 = vld [vmem:[#allocation2 + $0x94] sm:$0xf] }
 0x110   : > { %v2142_v55 = vor.u32 %v2349_v38, %v2139_v39 }
 0x111   : > { %v481_v63 = vpop.permute.xlu0 %480  ;;  %v483_v8 = vpop.permute.xlu1 %482 }
 0x112   : > { %1124 = vmatpush.bf16.msrb.mxu2 %v2182_v42  ;;  %1144 = vmatpush.bf16.msrb.mxu1 %v2198_v56  ;;  %v489_v41 = vsel %vm488_vm6, %v473_v37, %v481_v63  ;;  %v493_v61 = vsel %vm488_vm6, %v481_v63, %v473_v37  ;;  %v490_v10 = vsel %vm488_vm6, %v475_v60, %v483_v8 }
 0x113   : > { %v494_v14 = vsel %vm488_vm6, %v483_v8, %v475_v60  ;;  %v504_v18 = vmul.f32 %v2913_v22, %v493_v61  ;;  %v505_v13 = vmul.f32 %v2915_v9, %v489_v41  ;;  %v507_v20 = vmul.f32 %v2915_v9, %v490_v10  ;;  %v2089_v60 = vld [vmem:[#allocation2 + $0x30] sm:$0xf]  ;;  %v432_v54 = vpop.permute.xlu2 %431 }
 0x114   : > { %v506_v19 = vmul.f32 %v2913_v22, %v494_v14  ;;  %v2964_v22 = vperm.slane %v450_v21, 0  ;;  %v2966_v9 = vperm.slane %v450_v21, 1  ;;  %v2134_v41 = vor.u32 %v2347_v50, %v2131_v57 }
 0x115   : > { %v512_v24 = vpack.c.bf16 %v505_v13, %v504_v18 }
 0x116   : > { %1125 = vmatpush.bf16.msrb.mxu2 %v2174_v40  ;;  %v513_v25 = vpack.c.bf16 %v507_v20, %v506_v19  ;;  %v2338_v28 = vld [vmem:[#allocation2 + $0x34] sm:$0xf0]  ;;  %v2091_v30 = vld [vmem:[#allocation2 + $0x38] sm:$0xf0] }
 0x117   : > { %516 = vst [vmem:[#allocation2 + $0x20] sm:$0xff] %v512_v24  ;;  %v2090_v31 = vor.u32 %v2338_v28, %v2089_v60  ;;  %v2094_v0 = vor.u32 %v2337_v29, %v2091_v30  ;;  %v2053_v60 = vld [vmem:[%s3420_s2] sm:$0xf] }
 0x118   : > { %517 = vst [vmem:[#allocation2 + $0x28] sm:$0xff] %v513_v25 }
 0x119   : > { %v430_v1 = vpop.permute.xlu0 %429  ;;  %v436_v3 = vpop.permute.xlu1 %435  ;;  %1071 = vmatpush.bf16.msra.mxu0 %v2090_v31  ;;  %1113 = vmatpush.bf16.msra.mxu3 %v2094_v0 }
 0x11a   : > { %1126 = vmatpush.bf16.msrb.mxu2 %v2166_v59  ;;  %v444_v4 = vsel %vm441_vm8, %v428_v12, %v436_v3  ;;  %v448_v5 = vsel %vm441_vm8, %v436_v3, %v428_v12  ;;  %v445_v6 = vsel %vm441_vm8, %v430_v1, %v438_v26  ;;  %v449_v7 = vsel %vm441_vm8, %v438_v26, %v430_v1  ;;  %v2329_v26 = vld [vmem:[%s3420_s2 + $0x8] sm:$0xf0] }
 0x11b   : > { %v460_v34 = vmul.f32 %v2964_v22, %v448_v5  ;;  %v461_v35 = vmul.f32 %v2966_v9, %v444_v4  ;;  %v462_v36 = vmul.f32 %v2964_v22, %v449_v7  ;;  %v463_v37 = vmul.f32 %v2966_v9, %v445_v6 }
 0x11c   : > { %v2054_v31 = vor.u32 %v2329_v26, %v2053_v60 }
 0x11d   : > { %v466_v45 = vpack.c.bf16 %v461_v35, %v460_v34  ;;  %v467_v46 = vpack.c.bf16 %v463_v37, %v462_v36  ;;  %2208 = vmatmul.msk.bf16.vlgmr.msrb.gmra.mxu1 %vm1063_vm7, %v2935_v49 }
 0x11e   : > { %1127 = vmatpush.bf16.msrb.mxu2 %v2158_v2  ;;  %v2081_v52 = vld [vmem:[#allocation2 + $0x20] sm:$0xf]  ;;  %v2335_v16 = vld [vmem:[#allocation2 + $0x24] sm:$0xf] }
 0x11f   : > { %470 = vst [vmem:[#allocation2 + $0x10] sm:$0xff] %v466_v45  ;;  %v2336_v12 = vld [vmem:[#allocation2 + $0x24] sm:$0xf0]  ;;  %v2083_v53 = vld [vmem:[#allocation2 + $0x28] sm:$0xf0] }
 0x120   : > { %471 = vst [vmem:[#allocation2 + $0x18] sm:$0xff] %v467_v46  ;;  %v2082_v42 = vor.u32 %v2336_v12, %v2081_v52  ;;  %v2086_v56 = vor.u32 %v2335_v16, %v2083_v53 }
 0x121   : > { %v424_v58 = vpop.permute.xlu0 %423  ;;  %v426_v15 = vpop.permute.xlu1 %425 }
 0x122   : > { %1128 = vmatpush.bf16.msrb.mxu2 %v2150_v47  ;;  %1072 = vmatpush.bf16.msra.mxu0 %v2082_v42  ;;  %v442_v48 = vsel %vm441_vm8, %v424_v58, %v432_v54  ;;  %v446_v63 = vsel %vm441_vm8, %v432_v54, %v424_v58 }
 0x123   : > { %1114 = vmatpush.bf16.msra.mxu3 %v2086_v56  ;;  %v456_v8 = vmul.f32 %v2964_v22, %v446_v63  ;;  %v457_v40 = vmul.f32 %v2966_v9, %v442_v48  ;;  %v1399_v63 = vld [vmem:[%s3423_s5 + $0x10] sm:$0xff] }
 0x125   : > { %v464_v61 = vpack.c.bf16 %v457_v40, %v456_v8  ;;  %v1397_v8 = vld [vmem:[%s3423_s5] sm:$0xff]  ;;  %v1398_v40 = vld [vmem:[%s3423_s5 + $0x8] sm:$0xff] }
 0x126   : > { %1129 = vmatpush.bf16.msrb.mxu2 %v2142_v55  ;;  %v2073_v10 = vld [vmem:[#allocation2 + $0x10] sm:$0xf]  ;;  %v2333_v14 = vld [vmem:[#allocation2 + $0x14] sm:$0xf] }
 0x127   : > { %468 = vst [vmem:[#allocation2] sm:$0xff] %v464_v61  ;;  %v2334_v17 = vld [vmem:[#allocation2 + $0x14] sm:$0xf0]  ;;  %v2075_v18 = vld [vmem:[#allocation2 + $0x18] sm:$0xf0]  ;;  %v1628_v61 = vld [vmem:[%s3425_s7] sm:$0xff] }
 0x128   : > { %v2074_v13 = vor.u32 %v2334_v17, %v2073_v10  ;;  %v2078_v19 = vor.u32 %v2333_v14, %v2075_v18  ;;  %v1629_v10 = vld [vmem:[%s3425_s7 + $0x8] sm:$0xff] }
 0x129   : > { %v434_v20 = vpop.permute.xlu0 %433 }
 0x12a   : > { %1130 = vmatpush.bf16.msrb.mxu2 %v2134_v41  ;;  %v443_v21 = vsel %vm441_vm8, %v426_v15, %v434_v20  ;;  %v447_v23 = vsel %vm441_vm8, %v434_v20, %v426_v15  ;;  %1073 = vmatpush.bf16.msra.mxu0 %v2074_v13  ;;  %v1631_v15 = vld [vmem:[%s3425_s7 + $0x18] sm:$0xff]  ;;  %v3066_v20 = vld [vmem:[%s3419_s1 + $0x6] ss:$8 sm:$0x3] }
 0x12b   : > { %1115 = vmatpush.bf16.msra.mxu3 %v2078_v19  ;;  %v458_v49 = vmul.f32 %v2964_v22, %v447_v23  ;;  %v459_v24 = vmul.f32 %v2966_v9, %v443_v21  ;;  %v1337_v21 = vperm.slane %v3066_v20, 0  ;;  %v1338_v23 = vperm.slane %v3066_v20, 1 }
 0x12d   : > { %1131 = vmatmul.bf16.vlgmr.msrb.gmra.mxu2 %v2945_v62  ;;  %v465_v25 = vpack.c.bf16 %v459_v24, %v458_v49 }
 0x12e   : > { %v2065_v59 = vld [vmem:[#allocation2] sm:$0xf]  ;;  %v2331_v28 = vld [vmem:[#allocation2 + $0x4] sm:$0xf] }
 0x12f   : > { %469 = vst [vmem:[#allocation2 + $0x8] sm:$0xff] %v465_v25 }
 0x136   : > { %v2332_v27 = vld [vmem:[#allocation2 + $0x4] sm:$0xf0]  ;;  %v2067_v29 = vld [vmem:[#allocation2 + $0x8] sm:$0xf0] }
 0x137   : > { %v2066_v30 = vor.u32 %v2332_v27, %v2065_v59  ;;  %v2070_v22 = vor.u32 %v2331_v28, %v2067_v29  ;;  %v3083_v28 = vld [vmem:[%s3419_s1 + $0x3] ss:$8 sm:$0x3] }
 0x139   : > { %1074 = vmatpush.bf16.msra.mxu0 %v2066_v30  ;;  %1116 = vmatpush.bf16.msra.mxu3 %v2070_v22  ;;  %v1255_v30 = vperm.slane %v3083_v28, 0  ;;  %v1256_v22 = vperm.slane %v3083_v28, 1 }
 0x13c   : > { %1075 = vmatmul.bf16.vlgmr.msra.gmra.mxu0 %v2054_v31  ;;  %1117 = vmatmul.bf16.vlgmr.msra.gmra.mxu3 %v2054_v31 }
 0x166   : > { %v866_v32 = vpop.permute.xlu2 %865 }
 0x17d   : > { %v861_v3 = vpop.permute.xlu1 %860 }
 0x18a   : > { %v1090_v9 = vpop.f32.mrf.mxu1 }
 0x190   : > { %v1104_v62 = vpop.f32.mrf.mxu2 }
 0x192   : > { %v1092_v1 = vpop.f32.mrf.mxu1 }
 0x198   : > { %v1106_v0 = vpop.f32.mrf.mxu2 }
 0x19a   : > { %v1146_v34 = vpop.f32.mrf.mxu1 }
 0x1a2   : > { %v1148_v54 = vpop.f32.mrf.mxu1 }
 0x1b0   : > { %v1132_v6 = vpop.f32.mrf.mxu2 }
 0x1b8   : > { %v1134_v51 = vpop.f32.mrf.mxu2 }
 0x1b9   : > { %v1076_v2 = vpop.f32.mrf.mxu0 }
 0x1ba   : > { %v1077_v4 = vadd.f32 %v1076_v2, %v861_v3 }
 0x1bc   : > { %v1091_v5 = vadd.f32 %v1090_v9, %v1077_v4  ;;  %v2212_v4 = vld [vmem:[%s3419_s1 + $0x4] ss:$8 sm:$0x3] }
 0x1be   : > { %v1105_v7 = vadd.f32 %v1104_v62, %v1091_v5 }
 0x1bf   : > { %v1118_v33 = vpop.f32.mrf.mxu3 }
 0x1c0   : > { %vm1151_vm9 = vcmp.ge.f32.partialorder %v1105_v7, 0.0  ;;  %v1155_v35 = vmul.f32 0.05, %v1105_v7  ;;  %v1119_v36 = vadd.f32 %v1118_v33, %v861_v3 }
 0x1c1   : > { %v1078_v37 = vpop.f32.mrf.mxu0 }
 0x1c2   : > { %v1159_v38 = vsel %vm1151_vm9, %v1105_v7, %v1155_v35  ;;  %v1079_v39 = vadd.f32 %v1078_v37, %v866_v32  ;;  %v1133_v43 = vadd.f32 %v1132_v6, %v1119_v36  ;;  %v1285_v6 = vperm.slane %v2212_v4, 0 }
 0x1c3   : > { %1271 = vrot.lane.b32.xlu2 %v1159_v38, %s2455_s13  ;;  %1297 = vrot.lane.b32.xlu1 %v1159_v38, %s2453_s29  ;;  %v1286_v7 = vperm.slane %v2212_v4, 1 }
 0x1c4   : > { %v1093_v44 = vadd.f32 %v1092_v1, %v1079_v39  ;;  %v1147_v45 = vadd.f32 %v1146_v34, %v1133_v43  ;;  %1323 = vrot.lane.b32.xlu0 %v1159_v38, %s2451_s27  ;;  %v3109_v43 = vld [vmem:[%s3419_s1 + $0x5] ss:$8 sm:$0x3] }
 0x1c6   : > { %vm1152_vm10 = vcmp.ge.f32.partialorder %v1147_v45, 0.0  ;;  %v1156_v46 = vmul.f32 0.05, %v1147_v45  ;;  %v1107_v52 = vadd.f32 %v1106_v0, %v1093_v44  ;;  %v1311_v44 = vperm.slane %v3109_v43, 0 }
 0x1c7   : > { %v1120_v47 = vpop.f32.mrf.mxu3 }
 0x1c8   : > { %v1160_v16 = vsel %vm1152_vm10, %v1147_v45, %v1156_v46  ;;  %v1121_v12 = vadd.f32 %v1120_v47, %v866_v32  ;;  %v1157_v42 = vmul.f32 0.05, %v1107_v52  ;;  %vm1153_vm11 = vcmp.ge.f32.partialorder %v1107_v52, 0.0 }
 0x1c9   : > { %v1267_v53 = vpack.c.bf16 %v1160_v16, %v1159_v38  ;;  %v1312_v45 = vperm.slane %v3109_v43, 1 }
 0x1ca   : > { %v1135_v55 = vadd.f32 %v1134_v51, %v1121_v12  ;;  %v1161_v57 = vsel %vm1153_vm11, %v1107_v52, %v1157_v42 }
 0x1cb   : > { %1269 = vst [vmem:[#allocation3 + $0x40] sm:$0xff] %v1267_v53  ;;  %1189 = vrot.lane.b32.xlu2 %v1159_v38, %s2457_s17  ;;  %1215 = vrot.lane.b32.xlu1 %v1159_v38, %s2454_s30 }
 0x1cc   : > { %v1149_v56 = vadd.f32 %v1148_v54, %v1135_v55  ;;  %1241 = vrot.lane.b32.xlu0 %v1159_v38, %s2452_s28 }
 0x1ce   : > { %vm1154_vm12 = vcmp.ge.f32.partialorder %v1149_v56, 0.0  ;;  %v1158_v50 = vmul.f32 0.05, %v1149_v56 }
 0x1d0   : > { %v1162_v58 = vsel %vm1154_vm12, %v1149_v56, %v1158_v50  ;;  %v2209_v50 = vld [vmem:[%s3419_s1 + $0x1] ss:$8 sm:$0x3] }
 0x1d1   : > { %v1268_v48 = vpack.c.bf16 %v1162_v58, %v1161_v57 }
 0x1d3   : > { %1270 = vst [vmem:[#allocation3 + $0x48] sm:$0xff] %v1268_v48  ;;  %1299 = vrot.lane.b32.xlu2 %v1161_v57, %s2453_s29  ;;  %1325 = vrot.lane.b32.xlu1 %v1161_v57, %s2451_s27 }
 0x1d4   : > { %1273 = vrot.lane.b32.xlu0 %v1161_v57, %s2455_s13 }
 0x1db   : > { %1217 = vrot.lane.b32.xlu2 %v1161_v57, %s2454_s30  ;;  %1243 = vrot.lane.b32.xlu1 %v1161_v57, %s2452_s28 }
 0x1dc   : > { %1191 = vrot.lane.b32.xlu0 %v1161_v57, %s2457_s17 }
 0x1e3   : > { %1275 = vrot.lane.b32.xlu1 %v1160_v16, %s2455_s13  ;;  %1327 = vrot.lane.b32.xlu2 %v1160_v16, %s2451_s27 }
 0x1e4   : > { %1301 = vrot.lane.b32.xlu0 %v1160_v16, %s2453_s29 }
 0x1eb   : > { %1193 = vrot.lane.b32.xlu1 %v1160_v16, %s2457_s17  ;;  %1245 = vrot.lane.b32.xlu2 %v1160_v16, %s2452_s28 }
 0x1ec   : > { %1219 = vrot.lane.b32.xlu0 %v1160_v16, %s2454_s30 }
 0x1f3   : > { %1351 = vrot.lane.b32.xlu1 %v1161_v57, %s2456_s14  ;;  %1277 = vrot.lane.b32.xlu2 %v1162_v58, %s2455_s13 }
 0x1f4   : > { %1329 = vrot.lane.b32.xlu0 %v1162_v58, %s2451_s27 }
 0x1fb   : > { %1303 = vrot.lane.b32.xlu1 %v1162_v58, %s2453_s29  ;;  %1353 = vrot.lane.b32.xlu2 %v1160_v16, %s2456_s14 }
 0x1fc   : > { %1349 = vrot.lane.b32.xlu0 %v1159_v38, %s2456_s14 }
 0x203   : > { %1163 = vrot.lane.b32.xlu1 %v1159_v38, %s2458_s25  ;;  %1195 = vrot.lane.b32.xlu2 %v1162_v58, %s2457_s17 }
 0x204   : > { %1247 = vrot.lane.b32.xlu0 %v1162_v58, %s2452_s28 }
 0x20b   : > { %1221 = vrot.lane.b32.xlu1 %v1162_v58, %s2454_s30  ;;  %1165 = vrot.lane.b32.xlu2 %v1161_v57, %s2458_s25 }
 0x20c   : > { %1355 = vrot.lane.b32.xlu0 %v1162_v58, %s2456_s14 }
 0x213   : > { %1169 = vrot.lane.b32.xlu1 %v1162_v58, %s2458_s25  ;;  %1413 = vperm.xlu2 %2409, %v1399_v63   ;;  %v3127_v58 = vld [vmem:[%s3419_s1 + $0x2] ss:$8 sm:$0x3]  ;;  %v1203_v63 = vperm.slane %v2209_v50, 0 }
 0x214   : > { %1167 = vrot.lane.b32.xlu0 %v1160_v16, %s2458_s25 }
 0x21b   : > { %1403 = vperm.xlu1 %2408, %v1397_v8   ;;  %1408 = vperm.xlu2 %2409, %v1398_v40   ;;  %v1204_v8 = vperm.slane %v2209_v50, 1  ;;  %v1229_v40 = vperm.slane %v3127_v58, 0 }
 0x21c   : > { %1418 = vperm.xlu0 %2410, %v1400_v11   ;;  %v3256_v11 = vld [vmem:[%s2541_s26 + $0x30] sm:$0xff] }
 0x21d   : > { %v1272_v41 = vpop.permute.xlu2 %1271 }
 0x223   : > { %1634 = vperm.xlu1 %2408, %v1628_v61   ;;  %1639 = vperm.xlu2 %2409, %v1629_v10  }
 0x225   : > { %v3054_v14 = vpop.permute.xlu2 %1189 }
 0x22b   : > { %1649 = vperm.xlu1 %2408, %v1631_v15  }
 0x22d   : > { %v3059_v17 = vpop.permute.xlu2 %1299 }
 0x235   : > { %v3061_v18 = vpop.permute.xlu2 %1217  ;;  %v1298_v13 = vpop.permute.xlu1 %1297 }
 0x236   : > { %v1324_v19 = vpop.permute.xlu0 %1323 }
 0x23d   : > { %v3070_v49 = vpop.permute.xlu1 %1215  ;;  %v1328_v24 = vpop.permute.xlu2 %1327 }
 0x23e   : > { %v1242_v25 = vpop.permute.xlu0 %1241  ;;  %v1331_v59 = vsel %vm736_vm0, %v1324_v19, %v1328_v24  ;;  %v1333_v60 = vsel %vm736_vm0, %v1328_v24, %v1324_v19 }
 0x23f   : > { %v1341_v26 = vmul.f32 %v1337_v21, %v1331_v59  ;;  %v1342_v27 = vmul.f32 %v1338_v23, %v1333_v60 }
 0x241   : > { %v1345_v29 = vpack.c.bf16 %v1342_v27, %v1341_v26 }
 0x243   : > { %1347 = vst [vmem:[#allocation3 + $0x70] sm:$0xff] %v1345_v29 }
 0x245   : > { %v3087_v31 = vpop.permute.xlu1 %1325  ;;  %v1246_v62 = vpop.permute.xlu2 %1245 }
 0x246   : > { %v1274_v9 = vpop.permute.xlu0 %1273  ;;  %v1249_v0 = vsel %vm584_vm1, %v1242_v25, %v1246_v62  ;;  %v1251_v1 = vsel %vm584_vm1, %v1246_v62, %v1242_v25 }
 0x247   : > { %v1259_v3 = vmul.f32 %v1255_v30, %v1251_v1  ;;  %v1260_v2 = vmul.f32 %v1256_v22, %v1249_v0 }
 0x249   : > { %v1263_v5 = vpack.c.bf16 %v1260_v2, %v1259_v3 }
 0x24b   : > { %1265 = vst [vmem:[#allocation3 + $0x30] sm:$0xff] %v1263_v5 }
 0x24d   : > { %v3100_v32 = vpop.permute.xlu1 %1243  ;;  %v1278_v33 = vpop.permute.xlu2 %1277 }
 0x24e   : > { %v1192_v34 = vpop.permute.xlu0 %1191  ;;  %v1280_v35 = vsel %vm640_vm4, %v1274_v9, %v1278_v33  ;;  %v1282_v36 = vsel %vm640_vm4, %v1278_v33, %v1274_v9  ;;  %v2215_v33 = vld [vmem:[%s3419_s1 + $0x7] ss:$8 sm:$0x3] }
 0x24f   : > { %v1291_v37 = vmul.f32 %v1285_v6, %v1280_v35  ;;  %v1292_v38 = vmul.f32 %v1286_v7, %v1282_v36  ;;  %v1363_v35 = vperm.slane %v2215_v33, 0  ;;  %v1364_v36 = vperm.slane %v2215_v33, 1 }
 0x251   : > { %v1294_v39 = vpack.c.bf16 %v1292_v38, %v1291_v37 }
 0x253   : > { %1296 = vst [vmem:[#allocation3 + $0x58] sm:$0xff] %v1294_v39 }
 0x255   : > { %v1276_v46 = vpop.permute.xlu1 %1275  ;;  %v1354_v47 = vpop.permute.xlu2 %1353 }
 0x256   : > { %v1279_v51 = vsel %vm640_vm4, %v1272_v41, %v1276_v46  ;;  %v1281_v52 = vsel %vm640_vm4, %v1276_v46, %v1272_v41  ;;  %v1302_v16 = vpop.permute.xlu0 %1301  ;;  %v1230_v41 = vperm.slane %v3127_v58, 1 }
 0x257   : > { %v1289_v12 = vmul.f32 %v1285_v6, %v1279_v51  ;;  %v1290_v53 = vmul.f32 %v1286_v7, %v1281_v52  ;;  %v1305_v54 = vsel %vm688_vm2, %v1298_v13, %v1302_v16  ;;  %v1307_v55 = vsel %vm688_vm2, %v1302_v16, %v1298_v13 }
 0x258   : > { %v1315_v42 = vmul.f32 %v1311_v44, %v1305_v54  ;;  %v1316_v56 = vmul.f32 %v1312_v45, %v1307_v55 }
 0x259   : > { %v1293_v57 = vpack.c.bf16 %v1290_v53, %v1289_v12  ;;  %v2290_v12 = vld [vmem:[#allocation3 + $0x70] sm:$0xf]  ;;  %v2385_v53 = vld [vmem:[#allocation3 + $0x74] sm:$0xf] }
 0x25a   : > { %v1319_v48 = vpack.c.bf16 %v1316_v56, %v1315_v42 }
 0x25b   : > { %1295 = vst [vmem:[#allocation3 + $0x50] sm:$0xff] %v1293_v57 }
 0x25c   : > { %1321 = vst [vmem:[#allocation3 + $0x60] sm:$0xff] %v1319_v48 }
 0x25d   : > { %v1194_v61 = vpop.permute.xlu1 %1193  ;;  %v1196_v10 = vpop.permute.xlu2 %1195 }
 0x25e   : > { %v1197_v15 = vsel %vm488_vm6, %v3054_v14, %v1194_v61  ;;  %v1199_v13 = vsel %vm488_vm6, %v1194_v61, %v3054_v14  ;;  %v1220_v19 = vpop.permute.xlu0 %1219  ;;  %v1198_v24 = vsel %vm488_vm6, %v1192_v34, %v1196_v10  ;;  %v1200_v25 = vsel %vm488_vm6, %v1196_v10, %v1192_v34 }
 0x25f   : > { %v1207_v59 = vmul.f32 %v1203_v63, %v1199_v13  ;;  %v1208_v60 = vmul.f32 %v1204_v8, %v1197_v15  ;;  %v1223_v26 = vsel %vm536_vm3, %v3070_v49, %v1220_v19  ;;  %v1225_v27 = vsel %vm536_vm3, %v1220_v19, %v3070_v49 }
 0x260   : > { %v1233_v14 = vmul.f32 %v1229_v40, %v1225_v27  ;;  %v1234_v29 = vmul.f32 %v1230_v41, %v1223_v26  ;;  %v1209_v62 = vmul.f32 %v1203_v63, %v1200_v25  ;;  %v1210_v9 = vmul.f32 %v1204_v8, %v1198_v24 }
 0x261   : > { %v1211_v0 = vpack.c.bf16 %v1208_v60, %v1207_v59  ;;  %v2276_v59 = vld [vmem:[#allocation3 + $0x58] sm:$0xf0] }
 0x262   : > { %v1237_v1 = vpack.c.bf16 %v1234_v29, %v1233_v14  ;;  %v1212_v3 = vpack.c.bf16 %v1210_v9, %v1209_v62  ;;  %v2274_v19 = vld [vmem:[#allocation3 + $0x50] sm:$0xf]  ;;  %v2381_v24 = vld [vmem:[#allocation3 + $0x54] sm:$0xf] }
 0x263   : > { %1213 = vst [vmem:[#allocation3 + $0x10] sm:$0xff] %v1211_v0  ;;  %v2282_v48 = vld [vmem:[#allocation3 + $0x60] sm:$0xf]  ;;  %v2383_v61 = vld [vmem:[#allocation3 + $0x64] sm:$0xf]  ;;  %v2279_v26 = vor.u32 %v2381_v24, %v2276_v59  ;;  %v1630_v59 = vld [vmem:[%s3425_s7 + $0x10] sm:$0xff] }
 0x264   : > { %1239 = vst [vmem:[#allocation3 + $0x20] sm:$0xff] %v1237_v1  ;;  %v2380_v1 = vld [vmem:[#allocation3 + $0x44] sm:$0xf0]  ;;  %1644 = vperm.xlu0 %2410, %v1630_v59  }
 0x265   : > { %1214 = vst [vmem:[#allocation3 + $0x18] sm:$0xff] %v1212_v3  ;;  %v3151_v2 = vpop.permute.xlu1 %1351  ;;  %v2268_v3 = vld [vmem:[#allocation3 + $0x48] sm:$0xf0] }
 0x266   : > { %v1330_v4 = vpop.permute.xlu0 %1329 }
 0x267   : > { %v1332_v49 = vsel %vm736_vm0, %v3087_v31, %v1330_v4  ;;  %v1334_v5 = vsel %vm736_vm0, %v1330_v4, %v3087_v31  ;;  %v2266_v4 = vld [vmem:[#allocation3 + $0x40] sm:$0xf] }
 0x268   : > { %v1343_v6 = vmul.f32 %v1337_v21, %v1332_v49  ;;  %v1344_v7 = vmul.f32 %v1338_v23, %v1334_v5  ;;  %v2379_v49 = vld [vmem:[#allocation3 + $0x44] sm:$0xf] }
 0x26a   : > { %v1346_v34 = vpack.c.bf16 %v1344_v7, %v1343_v6  ;;  %v2267_v6 = vor.u32 %v2380_v1, %v2266_v4  ;;  %v2271_v7 = vor.u32 %v2379_v49, %v2268_v3  ;;  %v2226_v1 = vld [vmem:[%s3422_s4 + $0x10] sm:$0xf]  ;;  %v2370_v3 = vld [vmem:[%s3422_s4 + $0x14] sm:$0xf0] }
 0x26c   : > { %1348 = vst [vmem:[#allocation3 + $0x78] sm:$0xff] %v1346_v34  ;;  %v1166_v34 = vpop.permute.xlu2 %1165  ;;  %v2244_v24 = vld [vmem:[#allocation3 + $0x18] sm:$0xf0] }
 0x26d   : > { %v1304_v37 = vpop.permute.xlu1 %1303 }
 0x26e   : > { %v1306_v38 = vsel %vm688_vm2, %v3059_v17, %v1304_v37  ;;  %v1308_v21 = vsel %vm688_vm2, %v1304_v37, %v3059_v17  ;;  %v1350_v31 = vpop.permute.xlu0 %1349 }
 0x26f   : > { %v1317_v20 = vmul.f32 %v1311_v44, %v1306_v38  ;;  %v1318_v23 = vmul.f32 %v1312_v45, %v1308_v21  ;;  %v1357_v39 = vsel %vm784_vm5, %v1350_v31, %v1354_v47  ;;  %v1359_v43 = vsel %vm784_vm5, %v1354_v47, %v1350_v31 }
 0x270   : > { %v1367_v46 = vmul.f32 %v1363_v35, %v1357_v39  ;;  %v1368_v51 = vmul.f32 %v1364_v36, %v1359_v43 }
 0x271   : > { %v1320_v52 = vpack.c.bf16 %v1318_v23, %v1317_v20 }
 0x272   : > { %v1371_v16 = vpack.c.bf16 %v1368_v51, %v1367_v46 }
 0x273   : > { %1322 = vst [vmem:[#allocation3 + $0x68] sm:$0xff] %v1320_v52  ;;  %v2386_v54 = vld [vmem:[#allocation3 + $0x74] sm:$0xf0]  ;;  %v2292_v55 = vld [vmem:[#allocation3 + $0x78] sm:$0xf0] }
 0x274   : > { %1373 = vst [vmem:[#allocation3 + $0x80] sm:$0xff] %v1371_v16  ;;  %v2291_v17 = vor.u32 %v2386_v54, %v2290_v12  ;;  %v2295_v42 = vor.u32 %v2385_v53, %v2292_v55  ;;  %v2250_v12 = vld [vmem:[#allocation3 + $0x20] sm:$0xf]  ;;  %v2375_v53 = vld [vmem:[#allocation3 + $0x24] sm:$0xf] }
 0x275   : > { %v3176_v44 = vpop.permute.xlu1 %1163  ;;  %v2367_v54 = vld [vmem:[%s3422_s4 + $0x4] sm:$0xf] }
 0x276   : > { %v1248_v45 = vpop.permute.xlu0 %1247  ;;  %1536 = vmatpush.bf16.msra.mxu1 %v2291_v17  ;;  %1574 = vmatpush.bf16.msra.mxu2 %v2295_v42  ;;  %v2220_v42 = vld [vmem:[%s3422_s4 + $0x8] sm:$0xf0] }
 0x277   : > { %v1250_v47 = vsel %vm584_vm1, %v3100_v32, %v1248_v45  ;;  %v1252_v56 = vsel %vm584_vm1, %v1248_v45, %v3100_v32  ;;  %v2382_v32 = vld [vmem:[#allocation3 + $0x54] sm:$0xf0] }
 0x278   : > { %v1261_v50 = vmul.f32 %v1255_v30, %v1252_v56  ;;  %v1262_v57 = vmul.f32 %v1256_v22, %v1250_v47  ;;  %v2275_v60 = vor.u32 %v2382_v32, %v2274_v19  ;;  %v2373_v19 = vld [vmem:[#allocation3 + $0x14] sm:$0xf] }
 0x279   : > { %v2247_v32 = vor.u32 %v2373_v19, %v2244_v24  ;;  %v3268_v24 = vld [vmem:[%s2541_s26 + $0x28] sm:$0xff] }
 0x27a   : > { %v1264_v63 = vpack.c.bf16 %v1262_v57, %v1261_v50  ;;  %v2384_v8 = vld [vmem:[#allocation3 + $0x64] sm:$0xf0]  ;;  %v2284_v10 = vld [vmem:[#allocation3 + $0x68] sm:$0xf0] }
 0x27b   : > { %v2283_v15 = vor.u32 %v2384_v8, %v2282_v48  ;;  %v2287_v13 = vor.u32 %v2383_v61, %v2284_v10  ;;  %v2298_v17 = vld [vmem:[#allocation3 + $0x80] sm:$0xf]  ;;  %v2387_v56 = vld [vmem:[#allocation3 + $0x84] sm:$0xf]  ;;  %v2242_v10 = vld [vmem:[#allocation3 + $0x10] sm:$0xf] }
 0x27c   : > { %1266 = vst [vmem:[#allocation3 + $0x38] sm:$0xff] %v1264_v63 }
 0x27d   : > { %v1222_v25 = vpop.permute.xlu1 %1221  ;;  %1537 = vmatpush.bf16.msra.mxu1 %v2283_v15  ;;  %1575 = vmatpush.bf16.msra.mxu2 %v2287_v13  ;;  %v2374_v15 = vld [vmem:[#allocation3 + $0x14] sm:$0xf0]  ;;  %v2223_v13 = vor.u32 %v2367_v54, %v2220_v42 }
 0x27e   : > { %v1224_v28 = vsel %vm536_vm3, %v3061_v18, %v1222_v25  ;;  %v1226_v30 = vsel %vm536_vm3, %v1222_v25, %v3061_v18  ;;  %v1356_v22 = vpop.permute.xlu0 %1355  ;;  %v1175_v18 = vld [vmem:[%s3419_s1] ss:$8 sm:$0x3]  ;;  %v2243_v25 = vor.u32 %v2374_v15, %v2242_v10 }
 0x27f   : > { %v1235_v27 = vmul.f32 %v1229_v40, %v1226_v30  ;;  %v1236_v14 = vmul.f32 %v1230_v41, %v1224_v28  ;;  %v1358_v29 = vsel %vm784_vm5, %v3151_v2, %v1356_v22  ;;  %v1360_v62 = vsel %vm784_vm5, %v1356_v22, %v3151_v2  ;;  %v2218_v28 = vld [vmem:[%s3422_s4] sm:$0xf] }
 0x280   : > { %v1369_v9 = vmul.f32 %v1363_v35, %v1358_v29  ;;  %v1370_v0 = vmul.f32 %v1364_v36, %v1360_v62  ;;  %v1177_v41 = vperm.slane %v1175_v18, 0  ;;  %v1178_v5 = vperm.slane %v1175_v18, 1  ;;  %v2258_v35 = vld [vmem:[#allocation3 + $0x30] sm:$0xf]  ;;  %v2377_v36 = vld [vmem:[#allocation3 + $0x34] sm:$0xf] }
 0x281   : > { %v1238_v40 = vpack.c.bf16 %v1236_v14, %v1235_v27  ;;  %1538 = vmatpush.bf16.msra.mxu1 %v2275_v60  ;;  %1576 = vmatpush.bf16.msra.mxu2 %v2279_v26  ;;  %v2368_v60 = vld [vmem:[%s3422_s4 + $0x4] sm:$0xf0]  ;;  %v2369_v18 = vld [vmem:[%s3422_s4 + $0x14] sm:$0xf]  ;;  %vm1814_vm5 = vcmask 15360  }
 0x282   : > { %v1372_v58 = vpack.c.bf16 %v1370_v0, %v1369_v9  ;;  %v2219_v62 = vor.u32 %v2368_v60, %v2218_v28  ;;  %v2228_v9 = vld [vmem:[%s3422_s4 + $0x18] sm:$0xf0] }
 0x283   : > { %1240 = vst [vmem:[#allocation3 + $0x28] sm:$0xff] %v1238_v40  ;;  %v2378_v2 = vld [vmem:[#allocation3 + $0x34] sm:$0xf0]  ;;  %v2260_v33 = vld [vmem:[#allocation3 + $0x38] sm:$0xf0]  ;;  %v2231_v0 = vor.u32 %v2369_v18, %v2228_v9  ;;  %v2227_v40 = vor.u32 %v2370_v3, %v2226_v1 }
 0x284   : > { %1374 = vst [vmem:[#allocation3 + $0x88] sm:$0xff] %v1372_v58  ;;  %v2259_v20 = vor.u32 %v2378_v2, %v2258_v35  ;;  %v2263_v23 = vor.u32 %v2377_v36, %v2260_v33 }
 0x285   : > { %v1170_v37 = vpop.permute.xlu1 %1169  ;;  %1539 = vmatpush.bf16.msra.mxu1 %v2267_v6  ;;  %1577 = vmatpush.bf16.msra.mxu2 %v2271_v7  ;;  %v1414_v7 = vpop.permute.xlu2 %1413 }
 0x286   : > { %v1172_v38 = vsel %vm441_vm8, %v1166_v34, %v1170_v37  ;;  %v1174_v21 = vsel %vm441_vm8, %v1170_v37, %v1166_v34  ;;  %v1168_v31 = vpop.permute.xlu0 %1167 }
 0x287   : > { %v1183_v39 = vmul.f32 %v1177_v41, %v1174_v21  ;;  %v1184_v43 = vmul.f32 %v1178_v5, %v1172_v38  ;;  %v1171_v46 = vsel %vm441_vm8, %v3176_v44, %v1168_v31  ;;  %v1173_v51 = vsel %vm441_vm8, %v1168_v31, %v3176_v44 }
 0x288   : > { %v1181_v52 = vmul.f32 %v1177_v41, %v1173_v51  ;;  %v1182_v16 = vmul.f32 %v1178_v5, %v1171_v46 }
 0x289   : > { %v1186_v55 = vpack.c.bf16 %v1184_v43, %v1183_v39  ;;  %1540 = vmatpush.bf16.msra.mxu1 %v2259_v20  ;;  %1578 = vmatpush.bf16.msra.mxu2 %v2263_v23 }
 0x28a   : > { %v1185_v44 = vpack.c.bf16 %v1182_v16, %v1181_v52  ;;  %v2376_v45 = vld [vmem:[#allocation3 + $0x24] sm:$0xf0]  ;;  %v2252_v47 = vld [vmem:[#allocation3 + $0x28] sm:$0xf0] }
 0x28b   : > { %1188 = vst [vmem:[#allocation3 + $0x8] sm:$0xff] %v1186_v55  ;;  %v2251_v50 = vor.u32 %v2376_v45, %v2250_v12  ;;  %v2388_v57 = vld [vmem:[#allocation3 + $0x84] sm:$0xf0]  ;;  %v2255_v48 = vor.u32 %v2375_v53, %v2252_v47  ;;  %v2300_v63 = vld [vmem:[#allocation3 + $0x88] sm:$0xf0] }
 0x28c   : > { %1187 = vst [vmem:[#allocation3] sm:$0xff] %v1185_v44  ;;  %v2299_v8 = vor.u32 %v2388_v57, %v2298_v17  ;;  %v2303_v61 = vor.u32 %v2387_v56, %v2300_v63  ;;  %v3252_v17 = vld [vmem:[%s2541_s26 + $0x20] sm:$0xff]  ;;  %v3260_v56 = vld [vmem:[%s2541_s26 + $0x10] sm:$0xff] }
 0x28d   : > { %1541 = vmatpush.bf16.msra.mxu1 %v2251_v50  ;;  %1579 = vmatpush.bf16.msra.mxu2 %v2255_v48  ;;  %v1409_v35 = vpop.permute.xlu2 %1408  ;;  %v1404_v31 = vpop.permute.xlu1 %1403 }
 0x28e   : > { %1562 = vmatpush.bf16.msrb.mxu3 %v2299_v8  ;;  %1600 = vmatpush.bf16.msrb.mxu0 %v2303_v61  ;;  %v1419_v23 = vpop.permute.xlu0 %1418  ;;  %v3264_v61 = vld [vmem:[%s2541_s26] sm:$0xff] }
 0x291   : > { %2304 = vmatmul.msk.bf16.vlgmr.msrb.gmra.mxu3 %vm1529_vm13, %v2223_v13  ;;  %1542 = vmatpush.bf16.msra.mxu1 %v2243_v25 }
 0x292   : > { %1580 = vmatpush.bf16.msra.mxu2 %v2247_v32  ;;  %v2372_v30 = vld [vmem:[#allocation3 + $0x4] sm:$0xf0]  ;;  %v2236_v22 = vld [vmem:[#allocation3 + $0x8] sm:$0xf0]  ;;  %2306 = vmatmul.msk.bf16.vlgmr.msrb.gmra.mxu0 %vm1529_vm13, %v2223_v13  ;;  %v3272_v32 = vld [vmem:[%s2541_s26 + $0x38] sm:$0xff] }
 0x293   : > { %v2234_v26 = vld [vmem:[#allocation3] sm:$0xf]  ;;  %v2371_v27 = vld [vmem:[#allocation3 + $0x4] sm:$0xf] }
 0x294   : > { %v2235_v14 = vor.u32 %v2372_v30, %v2234_v26  ;;  %v2239_v29 = vor.u32 %v2371_v27, %v2236_v22  ;;  %v2389_v30 = vld [vmem:[%s3424_s6] sm:$0xff]  ;;  %v3279_v22 = vld [vmem:[%s2541_s26 + $0x18] sm:$0xff]  ;;  %v3283_v27 = vld [vmem:[%s2541_s26 + $0x8] sm:$0xff] }
 0x295   : > { %v1635_v18 = vpop.permute.xlu1 %1634 }
 0x296   : > { %1543 = vmatpush.bf16.msra.mxu1 %v2235_v14  ;;  %1581 = vmatpush.bf16.msra.mxu2 %v2239_v29 }
 0x299   : > { %1544 = vmatmul.bf16.vlgmr.msra.gmra.mxu1 %v2219_v62  ;;  %1582 = vmatmul.bf16.vlgmr.msra.gmra.mxu2 %v2219_v62  ;;  %v2390_v62 = vld [vmem:[%s3424_s6 + $0x8] sm:$0xff] }
 0x2a1   : > { %2305 = vmatmul.msk.bf16.gmra.mxu3 %vm1529_vm13, %v2231_v0 }
 0x2a2   : > { %2307 = vmatmul.msk.bf16.gmra.mxu0 %vm1529_vm13, %v2231_v0 }
 0x2a9   : > { %1549 = vmatmul.bf16.gmra.mxu1 %v2227_v40  ;;  %1587 = vmatmul.bf16.gmra.mxu2 %v2227_v40 }
 0x30f   : > { %v1602_v4 = vpop.f32.mrf.mxu0 }
 0x314   : > { %v1564_v58 = vpop.f32.mrf.mxu3 }
 0x316   : > { %v1545_v41 = vpop.f32.mrf.mxu1 }
 0x317   : > { %v1604_v2 = vpop.f32.mrf.mxu0  ;;  %v1546_v43 = vadd.f32 %v1545_v41, %v1404_v31 }
 0x319   : > { %v1565_v54 = vadd.f32 %v1564_v58, %v1546_v43  ;;  %v1640_v58 = vpop.permute.xlu2 %1639 }
 0x31b   : > { %v1612_v10 = vadd.f32 %v3264_v61, %v1565_v54 }
 0x31c   : > { %v1566_v49 = vpop.f32.mrf.mxu3  ;;  %v1583_v5 = vpop.f32.mrf.mxu2 }
 0x31d   : > { %v1584_v45 = vadd.f32 %v1583_v5, %v1404_v31 }
 0x31e   : > { %v1547_v6 = vpop.f32.mrf.mxu1 }
 0x31f   : > { %v1607_v38 = vpop.f32.mrf.mxu0  ;;  %v1548_v20 = vadd.f32 %v1547_v6, %v1409_v35  ;;  %v1603_v19 = vadd.f32 %v1602_v4, %v1584_v45 }
 0x321   : > { %v1567_v16 = vadd.f32 %v1566_v49, %v1548_v20  ;;  %v1613_v14 = vadd.f32 %v3283_v27, %v1603_v19 }
 0x323   : > { %v1614_v50 = vadd.f32 %v3260_v56, %v1567_v16 }
 0x324   : > { %v1585_v33 = vpop.f32.mrf.mxu2  ;;  %v1569_v34 = vpop.f32.mrf.mxu3 }
 0x325   : > { %v1586_v55 = vadd.f32 %v1585_v33, %v1409_v35  ;;  %v1624_v28 = vpack.c.bf16 %v1614_v50, %v1612_v10 }
 0x326   : > { %v1550_v37 = vpop.f32.mrf.mxu1 }
 0x327   : > { %v1551_v36 = vadd.f32 %v1550_v37, %v1414_v7  ;;  %v1609_v8 = vpop.f32.mrf.mxu0  ;;  %v1605_v15 = vadd.f32 %v1604_v2, %v1586_v55 }
 0x329   : > { %v1570_v46 = vadd.f32 %v1569_v34, %v1551_v36  ;;  %v1615_v60 = vadd.f32 %v3279_v22, %v1605_v15  ;;  %v1650_v36 = vpop.permute.xlu1 %1649 }
 0x32b   : > { %v1616_v42 = vadd.f32 %v3252_v17, %v1570_v46  ;;  %v1625_v29 = vpack.c.bf16 %v1615_v60, %v1613_v14 }
 0x32c   : > { %v1588_v21 = vpop.f32.mrf.mxu2  ;;  %v1571_v52 = vpop.f32.mrf.mxu3 }
 0x32d   : > { %v1589_v12 = vadd.f32 %v1588_v21, %v1414_v7  ;;  %v1645_v7 = vpop.permute.xlu0 %1644 }
 0x32e   : > { %v1552_v39 = vpop.f32.mrf.mxu1 }
 0x32f   : > { %v1553_v51 = vadd.f32 %v1552_v39, %v1419_v23  ;;  %v1608_v57 = vadd.f32 %v1607_v38, %v1589_v12 }
 0x331   : > { %v1572_v53 = vadd.f32 %v1571_v52, %v1553_v51  ;;  %v1617_v25 = vadd.f32 %v3268_v24, %v1608_v57 }
 0x333   : > { %v1618_v44 = vadd.f32 %v3256_v11, %v1572_v53 }
 0x334   : > { %v1590_v47 = vpop.f32.mrf.mxu2 }
 0x335   : > { %v1626_v48 = vpack.c.bf16 %v1618_v44, %v1616_v42  ;;  %v1591_v63 = vadd.f32 %v1590_v47, %v1419_v23 }
 0x337   : > { %v1610_v13 = vadd.f32 %v1609_v8, %v1591_v63  ;;  %1674 = vmatpush.bf16.msra.mxu3 %v1626_v48 }
 0x339   : > { %v1619_v59 = vadd.f32 %v3272_v32, %v1610_v13 }
 0x33b   : > { %v1627_v26 = vpack.c.bf16 %v1619_v59, %v1617_v25  ;;  %1675 = vmatpush.bf16.msra.mxu3 %v1624_v28 }
 0x33d   : > { %1693 = vmatpush.bf16.msra.mxu0 %v1627_v26 }
 0x33e   : > { %2316 = vmatmul.msk.bf16.vlgmr.msra.gmra.mxu3 %vm1063_vm7, %v2389_v30 }
 0x341   : > { %1694 = vmatpush.bf16.msra.mxu0 %v1625_v29 }
 0x344   : > { %2318 = vmatmul.msk.bf16.vlgmr.msra.gmra.mxu0 %vm1063_vm7, %v2389_v30 }
 0x34e   : > { %2317 = vmatmul.msk.bf16.gmra.mxu3 %vm1063_vm7, %v2390_v62 }
 0x354   : > { %2319 = vmatmul.msk.bf16.gmra.mxu0 %vm1063_vm7, %v2390_v62 }
 0x3c1   : > { %v1677_v9 = vpop.f32.mrf.mxu3  ;;  %v1696_v0 = vpop.f32.mrf.mxu0 }
 0x3c2   : > { %v3293_v1 = vadd.f32 %v1677_v9, %v1635_v18  ;;  %v3295_v3 = vadd.f32 %v1696_v0, %v1635_v18 }
 0x3c4   : > { %v1706_v40 = vadd.f32 %v3295_v3, %v3293_v1 }
 0x3c6   : > { %1707 = vadd.xlane.f32.xlu2 %v1706_v40 }
 0x3c9   : > { %v1679_v41 = vpop.f32.mrf.mxu3  ;;  %v1698_v4 = vpop.f32.mrf.mxu0 }
 0x3ca   : > { %v3299_v49 = vadd.f32 %v1679_v41, %v1640_v58  ;;  %v3301_v5 = vadd.f32 %v1698_v4, %v1640_v58 }
 0x3cc   : > { %v1709_v6 = vadd.f32 %v3301_v5, %v3299_v49 }
 0x3ce   : > { %1710 = vadd.xlane.f32.xlu0 %v1709_v6 }
 0x3d1   : > { %v1682_v2 = vpop.f32.mrf.mxu3  ;;  %v1701_v33 = vpop.f32.mrf.mxu0 }
 0x3d2   : > { %v3305_v34 = vadd.f32 %v1682_v2, %v1645_v7  ;;  %v3307_v37 = vadd.f32 %v1701_v33, %v1645_v7 }
 0x3d4   : > { %v1712_v35 = vadd.f32 %v3307_v37, %v3305_v34 }
 0x3d6   : > { %1713 = vadd.xlane.f32.xlu1 %v1712_v35 }
 0x3d9   : > { %v1684_v38 = vpop.f32.mrf.mxu3  ;;  %v1703_v21 = vpop.f32.mrf.mxu0 }
 0x3da   : > { %v3311_v31 = vadd.f32 %v1684_v38, %v1650_v36  ;;  %v3313_v20 = vadd.f32 %v1703_v21, %v1650_v36 }
 0x3dc   : > { %v1715_v23 = vadd.f32 %v3313_v20, %v3311_v31 }
 0x3de   : > { %1716 = vadd.xlane.f32.xlu2 %v1715_v23 }
 0x439   : > { %v1708_v39 = vpop.xlane.xlu2 %1707 }
 0x43a   : > { %v3317_v43 = vmul.f32 0.00390625, %v1708_v39 }
 0x43c   : > { %v1722_v46 = vsub.f32 %v3293_v1, %v3317_v43  ;;  %v1723_v51 = vsub.f32 %v3295_v3, %v3317_v43 }
 0x43e   : > { %v1730_v52 = vmul.f32 %v1722_v46, %v1722_v46  ;;  %v1731_v16 = vmul.f32 %v1723_v51, %v1723_v51 }
 0x440   : > { %v1738_v12 = vadd.f32 %v1731_v16, %v1730_v52 }
 0x441   : > { %v1711_v53 = vpop.xlane.xlu0 %1710 }
 0x442   : > { %v3323_v54 = vmul.f32 0.00390625, %v1711_v53  ;;  %1739 = vadd.xlane.f32.xlu2 %v1738_v12 }
 0x444   : > { %v1724_v55 = vsub.f32 %v3299_v49, %v3323_v54  ;;  %v1725_v42 = vsub.f32 %v3301_v5, %v3323_v54 }
 0x446   : > { %v1732_v44 = vmul.f32 %v1724_v55, %v1724_v55  ;;  %v1733_v45 = vmul.f32 %v1725_v42, %v1725_v42 }
 0x448   : > { %v1741_v47 = vadd.f32 %v1733_v45, %v1732_v44 }
 0x449   : > { %v1714_v50 = vpop.xlane.xlu1 %1713 }
 0x44a   : > { %v3329_v57 = vmul.f32 0.00390625, %v1714_v50  ;;  %1742 = vadd.xlane.f32.xlu0 %v1741_v47 }
 0x44c   : > { %v1726_v48 = vsub.f32 %v3305_v34, %v3329_v57  ;;  %v1727_v63 = vsub.f32 %v3307_v37, %v3329_v57 }
 0x44e   : > { %v1734_v8 = vmul.f32 %v1726_v48, %v1726_v48  ;;  %v1735_v10 = vmul.f32 %v1727_v63, %v1727_v63 }
 0x450   : > { %v1744_v15 = vadd.f32 %v1735_v10, %v1734_v8 }
 0x451   : > { %v1717_v13 = vpop.xlane.xlu2 %1716 }
 0x452   : > { %v3335_v19 = vmul.f32 0.00390625, %v1717_v13  ;;  %1745 = vadd.xlane.f32.xlu1 %v1744_v15 }
 0x454   : > { %v1728_v25 = vsub.f32 %v3311_v31, %v3335_v19  ;;  %v1729_v59 = vsub.f32 %v3313_v20, %v3335_v19 }
 0x456   : > { %v1736_v28 = vmul.f32 %v1728_v25, %v1728_v25  ;;  %v1737_v30 = vmul.f32 %v1729_v59, %v1729_v59 }
 0x458   : > { %v1747_v60 = vadd.f32 %v1737_v30, %v1736_v28 }
 0x45a   : > { %1748 = vadd.xlane.f32.xlu2 %v1747_v60  ;;  %v1807_v60 = vld [vmem:[%s3426_s8 + $0x8] sm:$0xff] }
 0x4b5   : > { %v1740_v26 = vpop.xlane.xlu2 %1739 }
 0x4b6   : > { %v1750_v14 = vmul.f32 0.00390625, %v1740_v26 }
 0x4b8   : > { %2411 = vrsqrt.f32 %v1750_v14  ;;  %vm1761_vm15 = vcmp.eq.f32.partialorder %v1750_v14, inf  ;;  %v1764_v48 = vand.u32 2147483648, %v1750_v14  ;;  %vm1763_vm1 = vcmp.eq.f32.partialorder %v1750_v14, 0.0 }
 0x4bd   : > { %v1743_v29 = vpop.xlane.xlu0 %1742 }
 0x4be   : > { %v2412_v62 = vpop.eup %2411  ;;  %v1751_v18 = vmul.f32 0.00390625, %v1743_v29 }
 0x4bf   : > { %v1755_v9 = vmul.f32 %v2412_v62, %v1750_v14 }
 0x4c0   : > { %2413 = vrsqrt.f32 %v1751_v18  ;;  %vm1773_vm14 = vcmp.eq.f32.partialorder %v1751_v18, inf  ;;  %v1776_v44 = vand.u32 2147483648, %v1751_v18  ;;  %vm1775_vm0 = vcmp.eq.f32.partialorder %v1751_v18, 0.0 }
 0x4c1   : > { %v1756_v0 = vmul.f32 %v2412_v62, %v1755_v9 }
 0x4c3   : > { %v1757_v4 = vmul.f32 0.5, %v1756_v0 }
 0x4c5   : > { %v1746_v40 = vpop.xlane.xlu1 %1745  ;;  %v1758_v2 = vsub.f32 1.5, %v1757_v4 }
 0x4c6   : > { %v2414_v58 = vpop.eup %2413  ;;  %v1752_v41 = vmul.f32 0.00390625, %v1746_v40 }
 0x4c7   : > { %v1767_v6 = vmul.f32 %v2414_v58, %v1751_v18  ;;  %v1759_v23 = vmul.f32 %v2412_v62, %v1758_v2  ;;  %v1806_v62 = vld [vmem:[%s3426_s8] sm:$0xff] }
 0x4c8   : > { %2415 = vrsqrt.f32 %v1752_v41  ;;  %vm1785_vm2 = vcmp.eq.f32.partialorder %v1752_v41, inf  ;;  %v1788_v13 = vand.u32 2147483648, %v1752_v41  ;;  %vm1787_vm3 = vcmp.eq.f32.partialorder %v1752_v41, 0.0 }
 0x4c9   : > { %v1768_v7 = vmul.f32 %v2414_v58, %v1767_v6  ;;  %v1760_v16 = vmul.f32 %v1759_v23, %v1750_v14  ;;  %v1809_v6 = vld [vmem:[%s3426_s8 + $0x18] sm:$0xff] }
 0x4cb   : > { %v1769_v33 = vmul.f32 0.5, %v1768_v7  ;;  %v1762_v45 = vsel %vm1761_vm15, %v1750_v14, %v1760_v16 }
 0x4cc   : > { %v1765_v15 = vsel %vm1763_vm1, %v1764_v48, %v1762_v45  ;;  %v1831_v45 = vld [vmem:[%s3428_s10] sm:$0xff] }
 0x4cd   : > { %v1770_v35 = vsub.f32 1.5, %v1769_v33  ;;  %v1749_v36 = vpop.xlane.xlu2 %1748  ;;  %v1802_v26 = vadd.f32 %v1765_v15, %v3317_v43 }
 0x4ce   : > { %v2416_v38 = vpop.eup %2415  ;;  %v1753_v21 = vmul.f32 0.00390625, %v1749_v36 }
 0x4cf   : > { %v1771_v39 = vmul.f32 %v2414_v58, %v1770_v35  ;;  %v1779_v46 = vmul.f32 %v2416_v38, %v1752_v41  ;;  %v1810_v40 = vmul.f32 %v1806_v62, %v1802_v26 }
 0x4d0   : > { %2417 = vrsqrt.f32 %v1753_v21  ;;  %vm1797_vm4 = vcmp.eq.f32.partialorder %v1753_v21, inf  ;;  %vm1799_vm6 = vcmp.eq.f32.partialorder %v1753_v21, 0.0 }
 0x4d1   : > { %v1772_v51 = vmul.f32 %v1771_v39, %v1751_v18  ;;  %v1780_v52 = vmul.f32 %v2416_v38, %v1779_v46  ;;  %v1815_v2 = vsel %vm1814_vm5, %v1810_v40, 0.0 }
 0x4d3   : > { %v1781_v12 = vmul.f32 0.5, %v1780_v52  ;;  %v1774_v53 = vsel %vm1773_vm14, %v1751_v18, %v1772_v51 }
 0x4d4   : > { %v1777_v63 = vsel %vm1775_vm0, %v1776_v44, %v1774_v53  ;;  %v1832_v44 = vld [vmem:[%s3428_s10 + $0x8] sm:$0xff] }
 0x4d5   : > { %v1782_v55 = vsub.f32 1.5, %v1781_v12  ;;  %v1803_v25 = vadd.f32 %v1777_v63, %v3323_v54  ;;  %v1808_v54 = vld [vmem:[%s3426_s8 + $0x10] sm:$0xff]  ;;  %v1828_v12 = vld [vmem:[%s3427_s9] sm:$0x1] }
 0x4d6   : > { %v2418_v42 = vpop.eup %2417 }
 0x4d7   : > { %v1783_v47 = vmul.f32 %v2416_v38, %v1782_v55  ;;  %v1791_v50 = vmul.f32 %v2418_v42, %v1753_v21  ;;  %v1811_v9 = vmul.f32 %v1807_v60, %v1803_v25  ;;  %v1852_v60 = vld [vmem:[%s3429_s11] sm:$0xff] }
 0x4d9   : > { %v1784_v8 = vmul.f32 %v1783_v47, %v1752_v41  ;;  %v1792_v10 = vmul.f32 %v2418_v42, %v1791_v50 }
 0x4db   : > { %v1786_v59 = vsel %vm1785_vm2, %v1752_v41, %v1784_v8  ;;  %v1793_v28 = vmul.f32 0.5, %v1792_v10  ;;  %v1800_v41 = vand.u32 2147483648, %v1753_v21 }
 0x4dc   : > { %v1789_v30 = vsel %vm1787_vm3, %v1788_v13, %v1786_v59  ;;  %v1834_v13 = vld [vmem:[%s3428_s10 + $0x18] sm:$0xff] }
 0x4dd   : > { %v1794_v29 = vsub.f32 1.5, %v1793_v28  ;;  %v1804_v14 = vadd.f32 %v1789_v30, %v3329_v57  ;;  %v1816_v57 = vsel %vm1814_vm5, %v1811_v9, 0.0  ;;  %v1854_v28 = vld [vmem:[%s3429_s11 + $0x10] sm:$0xff]  ;;  %v1853_v30 = vld [vmem:[%s3429_s11 + $0x8] sm:$0xff] }
 0x4de   : > { %v1817_v35 = vadd.f32 %v1816_v57, %v1815_v2 }
 0x4df   : > { %v1795_v18 = vmul.f32 %v2418_v42, %v1794_v29  ;;  %v1812_v58 = vmul.f32 %v1808_v54, %v1804_v14  ;;  %v1833_v42 = vld [vmem:[%s3428_s10 + $0x10] sm:$0xff] }
 0x4e1   : > { %v1796_v0 = vmul.f32 %v1795_v18, %v1753_v21  ;;  %v1818_v33 = vsel %vm1814_vm5, %v1812_v58, 0.0  ;;  %v1855_v58 = vld [vmem:[%s3429_s11 + $0x18] sm:$0xff] }
 0x4e2   : > { %v1819_v38 = vadd.f32 %v1818_v33, %v1817_v35 }
 0x4e3   : > { %v1798_v43 = vsel %vm1797_vm4, %v1753_v21, %v1796_v0 }
 0x4e4   : > { %v1801_v4 = vsel %vm1799_vm6, %v1800_v41, %v1798_v43 }
 0x4e5   : > { %v1805_v7 = vadd.f32 %v1801_v4, %v3335_v19 }
 0x4e7   : > { %v1813_v36 = vmul.f32 %v1809_v6, %v1805_v7 }
 0x4e9   : > { %v1820_v23 = vsel %vm1814_vm5, %v1813_v36, 0.0 }
 0x4ea   : > { %v1821_v39 = vadd.f32 %v1820_v23, %v1819_v38 }
 0x4ec   : > { %v1822_v21 = vrot.slane %v1821_v39, 4 }
 0x4ee   : > { %v1823_v46 = vadd.f32 %v1822_v21, %v1821_v39 }
 0x4f0   : > { %v1824_v51 = vrot.slane %v1823_v46, 2 }
 0x4f2   : > { %v1825_v52 = vadd.f32 %v1824_v51, %v1823_v46 }
 0x4f4   : > { %v1826_v16 = vrot.slane %v1825_v52, 1 }
 0x4f6   : > { %v1827_v19 = vadd.f32 %v1826_v16, %v1825_v52 }
 0x4f8   : > { %v1829_v53 = vadd.f32 %v1828_v12, %v1827_v19 }
 0x4fa   : > { %v1830_v55 = vmax.f32 %v1829_v53, 0.0 }
 0x4fc   : > { %v1835_v47 = vperm.slane %v1830_v55, 0 }
 0x4fe   : > { %v1838_v50 = vmul.f32 %v1835_v47, %v1833_v42  ;;  %v1837_v48 = vmul.f32 %v1835_v47, %v1832_v44  ;;  %v1836_v63 = vmul.f32 %v1835_v47, %v1831_v45  ;;  %v1839_v25 = vmul.f32 %v1835_v47, %v1834_v13 }
 0x500   : > { %v1846_v8 = vsel %vm1814_vm5, %v1838_v50, 0.0  ;;  %v1843_v10 = vsel %vm1814_vm5, %v1837_v48, 0.0  ;;  %v1840_v15 = vsel %vm1814_vm5, %v1836_v63, 0.0  ;;  %v1849_v59 = vsel %vm1814_vm5, %v1839_v25, 0.0 }
 0x501   : > { %1847 = vadd.xlane.f32.xlu2 %v1846_v8  ;;  %1844 = vadd.xlane.f32.xlu1 %v1843_v10 }
 0x502   : > { %1841 = vadd.xlane.f32.xlu0 %v1840_v15 }
 0x50a   : > { %1850 = vadd.xlane.f32.xlu0 %v1849_v59 }
 0x574   : > { %v1848_v26 = vpop.xlane.xlu2 %1847  ;;  %v1845_v29 = vpop.xlane.xlu1 %1844 }
 0x575   : > { %v1858_v14 = vadd.f32 %v1854_v28, %v1848_v26  ;;  %v1857_v62 = vadd.f32 %v1853_v30, %v1845_v29  ;;  %v1842_v54 = vpop.xlane.xlu0 %1841 }
 0x576   : > { %v1856_v18 = vadd.f32 %v1852_v60, %v1842_v54 }
 0x577   : > { %v2322_v9 = vmul.f32 -1.442695, %v1858_v14  ;;  %v2321_v0 = vmul.f32 -1.442695, %v1857_v62 }
 0x578   : > { %v2320_v40 = vmul.f32 -1.442695, %v1856_v18 }
 0x579   : > { %2419 = vpow2.f32 %v2322_v9 }
 0x57a   : > { %2421 = vpow2.f32 %v2321_v0 }
 0x57b   : > { %2423 = vpow2.f32 %v2320_v40 }
 0x57d   : > { %v1851_v41 = vpop.xlane.xlu0 %1850 }
 0x57e   : > { %v1859_v43 = vadd.f32 %v1855_v58, %v1851_v41 }
 0x57f   : > { %v2420_v57 = vpop.eup %2419 }
 0x580   : > { %v2422_v4 = vpop.eup %2421  ;;  %v1874_v6 = vadd.f32 1.0, %v2420_v57  ;;  %v2323_v33 = vmul.f32 -1.442695, %v1859_v43 }
 0x581   : > { %v2424_v7 = vpop.eup %2423  ;;  %v1873_v2 = vadd.f32 1.0, %v2422_v4 }
 0x582   : > { %2425 = vrcp.f32 %v1874_v6  ;;  %v1872_v35 = vadd.f32 1.0, %v2424_v7  ;;  %vm1911_vm7 = vweird.f32 %v1874_v6  ;;  %v1915_v52 = vand.u32 2147483647, %v1874_v6 }
 0x583   : > { %2427 = vrcp.f32 %v1873_v2  ;;  %v1900_v53 = vand.u32 2147483647, %v1873_v2  ;;  %v1917_v55 = vand.u32 2147483648, %v1874_v6  ;;  %v1902_v42 = vand.u32 2147483648, %v1873_v2 }
 0x584   : > { %2429 = vrcp.f32 %v1872_v35  ;;  %v1887_v50 = vand.u32 2147483648, %v1872_v35  ;;  %v1885_v8 = vand.u32 2147483647, %v1872_v35  ;;  %vm1896_vm11 = vweird.f32 %v1873_v2 }
 0x585   : > { %2431 = vpow2.f32 %v2323_v33  ;;  %vm1916_vm13 = vcmp.eq.f32.partialorder %v1915_v52, 8.507059e+37  ;;  %v1918_v15 = vor.u32 1.1754944e-38, %v1917_v55  ;;  %v1903_v13 = vor.u32 1.1754944e-38, %v1902_v42 }
 0x586   : > { %vm1881_vm15 = vweird.f32 %v1872_v35  ;;  %vm1901_vm0 = vcmp.eq.f32.partialorder %v1900_v53, 8.507059e+37  ;;  %v1888_v60 = vor.u32 1.1754944e-38, %v1887_v50  ;;  %vm1886_vm2 = vcmp.eq.f32.partialorder %v1885_v8, 8.507059e+37 }
 0x588   : > { %v2426_v36 = vpop.eup %2425 }
 0x589   : > { %v2428_v38 = vpop.eup %2427  ;;  %v1907_v23 = vmul.f32 %v2426_v36, %v1874_v6  ;;  %vm1912_vm8 = vweird.f32 %v2426_v36 }
 0x58a   : > { %v2430_v39 = vpop.eup %2429  ;;  %v1892_v21 = vmul.f32 %v2428_v38, %v1873_v2  ;;  %vm1897_vm9 = vweird.f32 %v2428_v38  ;;  %vm1913_vm12 = vmor %vm1911_vm7, %vm1912_vm8 }
 0x58b   : > { %v2432_v46 = vpop.eup %2431  ;;  %v1908_v51 = vsub.f32 1.0, %v1907_v23  ;;  %v1877_v16 = vmul.f32 %v2430_v39, %v1872_v35  ;;  %vm1882_vm10 = vweird.f32 %v2430_v39  ;;  %vm1898_vm14 = vmor %vm1896_vm11, %vm1897_vm9 }
 0x58c   : > { %v1875_v12 = vadd.f32 1.0, %v2432_v46  ;;  %v1893_v19 = vsub.f32 1.0, %v1892_v21  ;;  %vm1883_vm1 = vmor %vm1881_vm15, %vm1882_vm10 }
 0x58d   : > { %v1909_v44 = vmul.f32 %v2426_v36, %v1908_v51  ;;  %v1878_v45 = vsub.f32 1.0, %v1877_v16 }
 0x58e   : > { %2433 = vrcp.f32 %v1875_v12  ;;  %v1894_v47 = vmul.f32 %v2428_v38, %v1893_v19  ;;  %v1932_v9 = vand.u32 2147483648, %v1875_v12  ;;  %v1930_v40 = vand.u32 2147483647, %v1875_v12 }
 0x58f   : > { %v1910_v48 = vadd.f32 %v2426_v36, %v1909_v44  ;;  %v1879_v63 = vmul.f32 %v2430_v39, %v1878_v45  ;;  %vm1926_vm4 = vweird.f32 %v1875_v12 }
 0x590   : > { %v1895_v10 = vadd.f32 %v2428_v38, %v1894_v47  ;;  %v1933_v41 = vor.u32 1.1754944e-38, %v1932_v9  ;;  %vm1931_vm6 = vcmp.eq.f32.partialorder %v1930_v40, 8.507059e+37 }
 0x591   : > { %v1914_v25 = vsel %vm1913_vm12, %v2426_v36, %v1910_v48  ;;  %v1880_v59 = vadd.f32 %v2430_v39, %v1879_v63 }
 0x592   : > { %v1899_v28 = vsel %vm1898_vm14, %v2428_v38, %v1895_v10  ;;  %v1919_v30 = vsel %vm1916_vm13, %v1918_v15, %v1914_v25 }
 0x593   : > { %v1904_v26 = vsel %vm1901_vm0, %v1903_v13, %v1899_v28  ;;  %1948 = vperm.xlu0 %2410, %v1919_v30   ;;  %v1884_v29 = vsel %vm1883_vm1, %v2430_v39, %v1880_v59 }
 0x594   : > { %v2434_v14 = vpop.eup %2433  ;;  %1943 = vperm.xlu2 %2409, %v1904_v26   ;;  %v1889_v62 = vsel %vm1886_vm2, %v1888_v60, %v1884_v29 }
 0x595   : > { %1938 = vperm.xlu1 %2408, %v1889_v62   ;;  %v1922_v54 = vmul.f32 %v2434_v14, %v1875_v12  ;;  %vm1927_vm3 = vweird.f32 %v2434_v14 }
 0x596   : > { %vm1928_vm5 = vmor %vm1926_vm4, %vm1927_vm3 }
 0x597   : > { %v1923_v18 = vsub.f32 1.0, %v1922_v54 }
 0x599   : > { %v1924_v0 = vmul.f32 %v2434_v14, %v1923_v18 }
 0x59b   : > { %v1925_v58 = vadd.f32 %v2434_v14, %v1924_v0 }
 0x59d   : > { %v1929_v43 = vsel %vm1928_vm5, %v2434_v14, %v1925_v58 }
 0x59e   : > { %v1934_v57 = vsel %vm1931_vm6, %v1933_v41, %v1929_v43 }
 0x59f   : > { %1953 = vperm.xlu1 %2408, %v1934_v57  }
 0x5ee   : > { %v1944_v4 = vpop.permute.xlu2 %1943 }
 0x5ef   : > { %v1958_v6 = vmul.f32 %v1944_v4, %v3299_v49  ;;  %v1959_v7 = vmul.f32 %v1944_v4, %v3301_v5 }
 0x5f1   : > { %v1966_v2 = vadd.f32 %v3260_v56, %v1958_v6  ;;  %v1967_v33 = vadd.f32 %v3279_v22, %v1959_v7 }
 0x5f3   : > { %1974 = vst [vmem:[%s413_s19 + $0x10] sm:$0xff] %v1966_v2 }
 0x5f4   : > { %1975 = vst [vmem:[%s413_s19 + $0x18] sm:$0xff] %v1967_v33 }
 0x605   : > { %v1949_v35 = vpop.permute.xlu0 %1948 }
 0x606   : > { %v1960_v36 = vmul.f32 %v1949_v35, %v3305_v34  ;;  %v1961_v38 = vmul.f32 %v1949_v35, %v3307_v37 }
 0x607   : > { %v1939_v23 = vpop.permute.xlu1 %1938 }
 0x608   : > { %v1956_v49 = vmul.f32 %v1939_v23, %v3293_v1  ;;  %v1957_v5 = vmul.f32 %v1939_v23, %v3295_v3  ;;  %v1968_v39 = vadd.f32 %v3252_v17, %v1960_v36  ;;  %v1969_v21 = vadd.f32 %v3268_v24, %v1961_v38 }
 0x60a   : > { %v1964_v56 = vadd.f32 %v3264_v61, %v1956_v49  ;;  %v1965_v22 = vadd.f32 %v3283_v27, %v1957_v5  ;;  %1976 = vst [vmem:[%s413_s19 + $0x20] sm:$0xff] %v1968_v39 }
 0x60b   : > { %1977 = vst [vmem:[%s413_s19 + $0x28] sm:$0xff] %v1969_v21 }
 0x60c   : > { %1972 = vst [vmem:[%s413_s19] sm:$0xff] %v1964_v56 }
 0x60d   : > { %1973 = vst [vmem:[%s413_s19 + $0x8] sm:$0xff] %v1965_v22 }
 0x611   : > { %v1954_v34 = vpop.permute.xlu1 %1953 }
 0x612   : > { %v1962_v37 = vmul.f32 %v1954_v34, %v3311_v31  ;;  %v1963_v46 = vmul.f32 %v1954_v34, %v3313_v20 }
 0x614   : > { %v1970_v1 = vadd.f32 %v3256_v11, %v1962_v37  ;;  %v1971_v3 = vadd.f32 %v3272_v32, %v1963_v46 }
 0x616   : > { %1978 = vst [vmem:[%s413_s19 + $0x30] sm:$0xff] %v1970_v1 }
 0x617   : > { %1979 = vst [vmem:[%s413_s19 + $0x38] sm:$0xff] %v1971_v3 }
 0x618 PF: > { %s22_s21 = sadd.s32 1, %s2449_s21  }
 0x619   : > { %p19_p4 = scmp.ge.s32.totalorder %s22_s21, 4  }
 0x61b   :  { %21 = sbr.rel (!%p19_p4) target bundleno = 1 (0x1), region = 105 }

</bundles_post_ra>
